<compile_context>
chip_gen: v7x
topology: tpu7x:2x2x1
jax: 0.10.0
libtpu: 0.0.40
codegen_flags: <defaults>
</compile_context>

<pallas_src>
import functools

import numpy as np
import jax
import jax.numpy as jnp
from jax import lax
from jax.experimental import pallas as pl
from jax.experimental.pallas import tpu as pltpu

# ------------------------------- static config -------------------------------
B = 2          # batch
CIN = 4        # in_channels
COUT = 8       # out_channels
T = 4          # expansion factor t
H = W = 16     # input spatial size
REPEAT = 1     # number of residual blocks after the transition
EPS = 1e-5     # BatchNorm eps (PyTorch default)

CE1 = CIN * T                 # expanded channels in the transition      (16)
CE2 = COUT * T                # expanded channels in the residual blocks (32)
HO, WO = H // 2, W // 2       # spatial size after the stride-2 transition (8, 8)
HP1, WP1 = H + 2, W + 2       # zero-padded full-res grid (18, 18)
HP2, WP2 = HO + 2, WO + 2     # zero-padded half-res grid (10, 10)
P1 = HP1 * WP1                # flattened padded positions, stage 1 (324)
P2 = HP2 * WP2                # flattened padded positions, stage 2 (100)
NOUT = HO * WO                # interior output positions per image (64)
G1, G2 = 24, 16               # guard columns for lane-shifted depthwise taps (> WP + 1)
OFF1 = [(dy - 1) * WP1 + (dx - 1) for dy in range(3) for dx in range(3)]
OFF2 = [(dy - 1) * WP2 + (dx - 1) for dy in range(3) for dx in range(3)]


# ------------------------- constant selector / mask build --------------------
def _build_constants():
    # S1: stride-2 subsample of the full-res depthwise output into the padded
    #     half-res grid (halo columns all-zero -> halo of the result is exactly 0).
    # S2: interior gather of the padded half-res grid into a dense (Ho*Wo) layout.
    s1 = np.zeros((P1, P2), np.float32)
    s2 = np.zeros((P2, NOUT), np.float32)
    for yo in range(HO):
        for xo in range(WO):
            s1[(2 * yo + 1) * WP1 + (2 * xo + 1), (yo + 1) * WP2 + (xo + 1)] = 1.0
            s2[(yo + 1) * WP2 + (xo + 1), yo * WO + xo] = 1.0
    m1 = np.zeros((1, P1), np.float32)
    m1.reshape(HP1, WP1)[1:1 + H, 1:1 + W] = 1.0
    m2 = np.zeros((1, P2), np.float32)
    m2.reshape(HP2, WP2)[1:1 + HO, 1:1 + WO] = 1.0
    return (jnp.asarray(s1), jnp.asarray(s2), jnp.asarray(m1), jnp.asarray(m2))


# ------------------------------- fused kernel --------------------------------
def _make_kernel(repeat):
    n_fixed = 5 + 6  # x, m1, m2, S1, S2  +  transition params

    def kernel(*refs):
        (x_ref, m1_ref, m2_ref, s1_ref, s2_ref,
         we1_ref, be1_ref, wd1_ref, bd1_ref, wp1_ref, bp1_ref) = refs[:n_fixed]
        pos = n_fixed
        block_refs = []
        for _ in range(repeat):
            block_refs.append(refs[pos:pos + 6])
            pos += 6
        wfp_ref, bfp_ref = refs[pos:pos + 2]
        out_ref, proj_ref = refs[pos + 2:pos + 4]
        ext1_ref, ext2_ref = refs[pos + 4:pos + 6]

        f32 = jnp.float32
        # zero the guard-padded depthwise scratch (guards stay zero afterwards).
        ext1_ref[...] = jnp.zeros(ext1_ref.shape, f32)
        ext2_ref[...] = jnp.zeros(ext2_ref.shape, f32)

        x = x_ref[...]          # (CIN, P1)  zero-padded, flattened spatial
        m1 = m1_ref[...]        # (1, P1)    1 = interior, 0 = halo
        m2 = m2_ref[...]        # (1, P2)

        # ------------------ transition (stride 2, no residual) ------------------
        # expansion 1x1 ConvBN + ReLU  (MXU)
        h = jnp.dot(we1_ref[...], x, preferred_element_type=f32) + be1_ref[...]
        h = jnp.maximum(h, 0.0) * m1          # re-zero halo -> depthwise padding stays 0

        # depthwise 3x3 (BN scale folded into taps): 9 lane-shifted MACs on the VPU
        ext1_ref[:, G1:G1 + P1] = h
        wd1 = wd1_ref[...]                    # (CE1, 9)
        acc = jnp.zeros((CE1, P1), f32)
        for t, off in enumerate(OFF1):
            acc = acc + wd1[:, t:t + 1] * ext1_ref[:, G1 + off:G1 + off + P1]
        # stride-2 subsample + relayout onto the padded half-res grid (MXU), then BN bias + ReLU
        d = jnp.dot(acc, s1_ref[...], preferred_element_type=f32)     # (CE1, P2)
        d = jnp.maximum(d + bd1_ref[...], 0.0)

        # projection 1x1 ConvBN (no activation)
        a = jnp.dot(wp1_ref[...], d, preferred_element_type=f32) + bp1_ref[...]   # (COUT, P2)

        # ------------------ repeated inverted-residual blocks -------------------
        for (we2_ref, be2_ref, wd2_ref, bd2_ref, wp2_ref, bp2_ref) in block_refs:
            e = jnp.dot(we2_ref[...], a, preferred_element_type=f32) + be2_ref[...]
            e = jnp.maximum(e, 0.0) * m2      # zero halo before the depthwise conv
            ext2_ref[:, G2:G2 + P2] = e
            wd2 = wd2_ref[...]                # (CE2, 9)
            acc2 = jnp.zeros((CE2, P2), f32)
            for t, off in enumerate(OFF2):
                acc2 = acc2 + wd2[:, t:t + 1] * ext2_ref[:, G2 + off:G2 + off + P2]
            dd = jnp.maximum(acc2 + bd2_ref[...], 0.0)
            a = a + jnp.dot(wp2_ref[...], dd, preferred_element_type=f32) + bp2_ref[...]

        # ------------------ outputs: interior gather (lane dense) ---------------
        s2 = s2_ref[...]                      # (P2, HO*WO)
        out_ref[...] = jnp.dot(a, s2, preferred_element_type=f32)
        pr = jnp.dot(wfp_ref[...], a, preferred_element_type=f32) + bfp_ref[...]
        proj_ref[...] = jnp.dot(pr, s2, preferred_element_type=f32)

    return kernel


# ------------------------- BN folding (done in the wrapper) ------------------
def _fold_1x1(p):
    s = p["g"] / jnp.sqrt(p["v"] + EPS)
    return p["w"] * s[:, None], (p["b"] - p["m"] * s)[:, None]


def _fold_dw(p):
    c = p["w"].shape[0]
    s = p["g"] / jnp.sqrt(p["v"] + EPS)
    return (p["w"] * s[:, None, None]).reshape(c, 9), (p["b"] - p["m"] * s)[:, None]


# ------------------------------- forward wrapper ------------------------------
def encoder_block_forward(x, params):
    """x: (B, Cin, H, W) float32 NCHW. Returns (out, projection(out)), each (B, Cout, Ho, Wo)."""
    bsz = x.shape[0]
    s1, s2, m1, m2 = _build_constants()

    # layout plumbing: spatial zero-pad by 1 and flatten -> (B, Cin, Hp*Wp)
    xp = jnp.pad(x.astype(jnp.float32), ((0, 0), (0, 0), (1, 1), (1, 1)))
    x_cp = xp.reshape(bsz, CIN, P1)

    we1, be1 = _fold_1x1(params["t_e"])
    wd1, bd1 = _fold_dw(params["t_d"])
    wp1, bp1 = _fold_1x1(params["t_p"])
    flat = [x_cp, m1, m2, s1, s2, we1, be1, wd1, bd1, wp1, bp1]
    for blk in params["blocks"]:
        we2, be2 = _fold_1x1(blk["e"])
        wd2, bd2 = _fold_dw(blk["d"])
        wp2, bp2 = _fold_1x1(blk["p"])
        flat += [we2, be2, wd2, bd2, wp2, bp2]
    wfp, bfp = _fold_1x1(params["fp"])
    flat += [wfp, bfp]

    def _full(a):
        nd = a.ndim
        return pl.BlockSpec(a.shape, lambda b, _nd=nd: (0,) * _nd)

    in_specs = ([pl.BlockSpec((None, CIN, P1), lambda b: (b, 0, 0))]
                + [_full(a) for a in flat[1:]])
    out_shape = (jax.ShapeDtypeStruct((bsz, COUT, NOUT), jnp.float32),
                 jax.ShapeDtypeStruct((bsz, COUT, NOUT), jnp.float32))
    out_specs = (pl.BlockSpec((None, COUT, NOUT), lambda b: (b, 0, 0)),
                 pl.BlockSpec((None, COUT, NOUT), lambda b: (b, 0, 0)))

    out_cn, proj_cn = pl.pallas_call(
        _make_kernel(len(params["blocks"])),
        out_shape=out_shape,
        grid=(bsz,),
        in_specs=in_specs,
        out_specs=out_specs,
        scratch_shapes=[pltpu.VMEM((CE1, P1 + 2 * G1), jnp.float32),
                        pltpu.VMEM((CE2, P2 + 2 * G2), jnp.float32)],
        compiler_params=pltpu.CompilerParams(dimension_semantics=("parallel",)),
    )(*flat)

    out = out_cn.reshape(bsz, COUT, HO, WO)
    proj = proj_cn.reshape(bsz, COUT, HO, WO)
    return out, proj


# ------------------------------ parameter init --------------------------------
def init_params(key):
    keys = jax.random.split(key, 4 + 3 * REPEAT)

    def convbn(k, cout, cin):
        kw, kg, kb, km, kv = jax.random.split(k, 5)
        return {
            "w": (1.0 / np.sqrt(cin)) * jax.random.normal(kw, (cout, cin), jnp.float32),
            "g": 1.0 + 0.1 * jax.random.normal(kg, (cout,), jnp.float32),
            "b": 0.1 * jax.random.normal(kb, (cout,), jnp.float32),
            "m": 0.1 * jax.random.normal(km, (cout,), jnp.float32),
            "v": jax.random.uniform(kv, (cout,), jnp.float32, 0.5, 1.5),
        }

    def convbn_dw(k, c):
        kw, kg, kb, km, kv = jax.random.split(k, 5)
        return {
            "w": 0.35 * jax.random.normal(kw, (c, 3, 3), jnp.float32),
            "g": 1.0 + 0.1 * jax.random.normal(kg, (c,), jnp.float32),
            "b": 0.1 * jax.random.normal(kb, (c,), jnp.float32),
            "m": 0.1 * jax.random.normal(km, (c,), jnp.float32),
            "v": jax.random.uniform(kv, (c,), jnp.float32, 0.5, 1.5),
        }

    params = {
        "t_e": convbn(keys[0], CE1, CIN),
        "t_d": convbn_dw(keys[1], CE1),
        "t_p": convbn(keys[2], COUT, CE1),
        "blocks": [],
        "fp": convbn(keys[3], COUT, COUT),
    }
    for r in range(REPEAT):
        params["blocks"].append({
            "e": convbn(keys[4 + 3 * r], CE2, COUT),
            "d": convbn_dw(keys[5 + 3 * r], CE2),
            "p": convbn(keys[6 + 3 * r], COUT, CE2),
        })
    return params


# --------------------------- pure-JAX reference (check) -----------------------
def _bn_ref(y, p):
    s = p["g"] / jnp.sqrt(p["v"] + EPS)
    return y * s[None, :, None, None] + (p["b"] - p["m"] * s)[None, :, None, None]


def _conv1x1_ref(x, w):
    return lax.conv_general_dilated(x, w[:, :, None, None], (1, 1), "VALID",
                                    dimension_numbers=("NCHW", "OIHW", "NCHW"))


def _dw3x3_ref(x, w, stride):
    return lax.conv_general_dilated(x, w[:, None, :, :], (stride, stride),
                                    ((1, 1), (1, 1)),
                                    dimension_numbers=("NCHW", "OIHW", "NCHW"),
                                    feature_group_count=x.shape[1])


def reference_forward(x, params):
    relu = jax.nn.relu
    h = relu(_bn_ref(_conv1x1_ref(x, params["t_e"]["w"]), params["t_e"]))
    h = relu(_bn_ref(_dw3x3_ref(h, params["t_d"]["w"], 2), params["t_d"]))
    a = _bn_ref(_conv1x1_ref(h, params["t_p"]["w"]), params["t_p"])
    for blk in params["blocks"]:
        e = relu(_bn_ref(_conv1x1_ref(a, blk["e"]["w"]), blk["e"]))
        d = relu(_bn_ref(_dw3x3_ref(e, blk["d"]["w"], 1), blk["d"]))
        a = a + _bn_ref(_conv1x1_ref(d, blk["p"]["w"]), blk["p"])
    proj = _bn_ref(_conv1x1_ref(a, params["fp"]["w"]), params["fp"])
    return a, proj


# ------------------------------------ main ------------------------------------
if __name__ == "__main__":
    key = jax.random.PRNGKey(0)
    kx, kp = jax.random.split(key)
    x = jax.random.normal(kx, (B, CIN, H, W), jnp.float32)
    params = init_params(kp)

    fwd = jax.jit(encoder_block_forward)
    out, proj = fwd(x, params)
    jax.block_until_ready((out, proj))

    assert out.shape == (B, COUT, HO, WO)
    assert proj.shape == (B, COUT, HO, WO)

    ref_out, ref_proj = reference_forward(x, params)
    np.testing.assert_allclose(np.asarray(out), np.asarray(ref_out), rtol=2e-2, atol=2e-2)
    np.testing.assert_allclose(np.asarray(proj), np.asarray(ref_proj), rtol=2e-2, atol=2e-2)

    print("KERNEL_OK")
</pallas_src>

<mosaic_0001>
module attributes {stable_mosaic.version = 11 : i64} {
  func.func @kernel(%arg0: i32, %arg1: memref<1x4x324xf32, #tpu.memory_space<vmem>>, %arg2: memref<1x324xf32, #tpu.memory_space<vmem>>, %arg3: memref<1x100xf32, #tpu.memory_space<vmem>>, %arg4: memref<324x100xf32, #tpu.memory_space<vmem>>, %arg5: memref<100x64xf32, #tpu.memory_space<vmem>>, %arg6: memref<16x4xf32, #tpu.memory_space<vmem>>, %arg7: memref<16x1xf32, #tpu.memory_space<vmem>>, %arg8: memref<16x9xf32, #tpu.memory_space<vmem>>, %arg9: memref<16x1xf32, #tpu.memory_space<vmem>>, %arg10: memref<8x16xf32, #tpu.memory_space<vmem>>, %arg11: memref<8x1xf32, #tpu.memory_space<vmem>>, %arg12: memref<32x8xf32, #tpu.memory_space<vmem>>, %arg13: memref<32x1xf32, #tpu.memory_space<vmem>>, %arg14: memref<32x9xf32, #tpu.memory_space<vmem>>, %arg15: memref<32x1xf32, #tpu.memory_space<vmem>>, %arg16: memref<8x32xf32, #tpu.memory_space<vmem>>, %arg17: memref<8x1xf32, #tpu.memory_space<vmem>>, %arg18: memref<8x8xf32, #tpu.memory_space<vmem>>, %arg19: memref<8x1xf32, #tpu.memory_space<vmem>>, %arg20: memref<1x8x64xf32, #tpu.memory_space<vmem>>, %arg21: memref<1x8x64xf32, #tpu.memory_space<vmem>>, %arg22: memref<16x372xf32, #tpu.memory_space<vmem>>, %arg23: memref<32x132xf32, #tpu.memory_space<vmem>>) attributes {dimension_semantics = [#tpu.dimension_semantics<parallel>], iteration_bounds = array<i64: 2>, scalar_prefetch = 0 : i64, scratch_operands = 2 : i64, tpu.core_type = #tpu.core_type<tc>, window_params = [{transform_indices = @transform_0, window_bounds = array<i64: 1, 4, 324>}, {pipeline_mode = #tpu.pipeline_mode<synchronous>, transform_indices = @transform_1, window_bounds = array<i64: 1, 324>}, {pipeline_mode = #tpu.pipeline_mode<synchronous>, transform_indices = @transform_2, window_bounds = array<i64: 1, 100>}, {pipeline_mode = #tpu.pipeline_mode<synchronous>, transform_indices = @transform_3, window_bounds = array<i64: 324, 100>}, {pipeline_mode = #tpu.pipeline_mode<synchronous>, transform_indices = @transform_4, window_bounds = array<i64: 100, 64>}, {pipeline_mode = #tpu.pipeline_mode<synchronous>, transform_indices = @transform_5, window_bounds = array<i64: 16, 4>}, {pipeline_mode = #tpu.pipeline_mode<synchronous>, transform_indices = @transform_6, window_bounds = array<i64: 16, 1>}, {pipeline_mode = #tpu.pipeline_mode<synchronous>, transform_indices = @transform_7, window_bounds = array<i64: 16, 9>}, {pipeline_mode = #tpu.pipeline_mode<synchronous>, transform_indices = @transform_8, window_bounds = array<i64: 16, 1>}, {pipeline_mode = #tpu.pipeline_mode<synchronous>, transform_indices = @transform_9, window_bounds = array<i64: 8, 16>}, {pipeline_mode = #tpu.pipeline_mode<synchronous>, transform_indices = @transform_10, window_bounds = array<i64: 8, 1>}, {pipeline_mode = #tpu.pipeline_mode<synchronous>, transform_indices = @transform_11, window_bounds = array<i64: 32, 8>}, {pipeline_mode = #tpu.pipeline_mode<synchronous>, transform_indices = @transform_12, window_bounds = array<i64: 32, 1>}, {pipeline_mode = #tpu.pipeline_mode<synchronous>, transform_indices = @transform_13, window_bounds = array<i64: 32, 9>}, {pipeline_mode = #tpu.pipeline_mode<synchronous>, transform_indices = @transform_14, window_bounds = array<i64: 32, 1>}, {pipeline_mode = #tpu.pipeline_mode<synchronous>, transform_indices = @transform_15, window_bounds = array<i64: 8, 32>}, {pipeline_mode = #tpu.pipeline_mode<synchronous>, transform_indices = @transform_16, window_bounds = array<i64: 8, 1>}, {pipeline_mode = #tpu.pipeline_mode<synchronous>, transform_indices = @transform_17, window_bounds = array<i64: 8, 8>}, {pipeline_mode = #tpu.pipeline_mode<synchronous>, transform_indices = @transform_18, window_bounds = array<i64: 8, 1>}, {transform_indices = @transform_19, window_bounds = array<i64: 1, 8, 64>}, {transform_indices = @transform_20, window_bounds = array<i64: 1, 8, 64>}]} {
    %cst = arith.constant 0.000000e+00 : f32
    %0 = vector.broadcast %cst : f32 to vector<16x372xf32>
    %c0 = arith.constant 0 : index
    %c0_0 = arith.constant 0 : index
    %1 = vector.load %arg22[%c0, %c0_0] : memref<16x372xf32, #tpu.memory_space<vmem>>, vector<16x372xf32>
    tpu.vector_store %arg22[%c0, %c0_0], %0 {strides = array<i32>} : memref<16x372xf32, #tpu.memory_space<vmem>>, vector<16x372xf32>,
    %cst_1 = arith.constant 0.000000e+00 : f32
    %2 = vector.broadcast %cst_1 : f32 to vector<32x132xf32>
    %c0_2 = arith.constant 0 : index
    %c0_3 = arith.constant 0 : index
    %3 = vector.load %arg23[%c0_2, %c0_3] : memref<32x132xf32, #tpu.memory_space<vmem>>, vector<32x132xf32>
    tpu.vector_store %arg23[%c0_2, %c0_3], %2 {strides = array<i32>} : memref<32x132xf32, #tpu.memory_space<vmem>>, vector<32x132xf32>,
    %c0_4 = arith.constant 0 : index
    %c0_5 = arith.constant 0 : index
    %c0_6 = arith.constant 0 : index
    %4 = vector.load %arg1[%c0_4, %c0_5, %c0_6] : memref<1x4x324xf32, #tpu.memory_space<vmem>>, vector<1x4x324xf32>
    %5 = vector.shape_cast %4 : vector<1x4x324xf32> to vector<4x324xf32>
    %c0_7 = arith.constant 0 : index
    %c0_8 = arith.constant 0 : index
    %6 = vector.load %arg2[%c0_7, %c0_8] : memref<1x324xf32, #tpu.memory_space<vmem>>, vector<1x324xf32>
    %c0_9 = arith.constant 0 : index
    %c0_10 = arith.constant 0 : index
    %7 = vector.load %arg3[%c0_9, %c0_10] : memref<1x100xf32, #tpu.memory_space<vmem>>, vector<1x100xf32>
    %c0_11 = arith.constant 0 : index
    %c0_12 = arith.constant 0 : index
    %8 = vector.load %arg6[%c0_11, %c0_12] : memref<16x4xf32, #tpu.memory_space<vmem>>, vector<16x4xf32>
    %cst_13 = arith.constant dense<0.000000e+00> : vector<16x324xf32>
    %9 = tpu.matmul %8, %5, %cst_13 {dimension_numbers = #tpu.dot_dimension_numbers<[1], [0], [0], [1], [0, 0, 1, 1], [], []>} : vector<16x4xf32>, vector<4x324xf32>, vector<16x324xf32> -> vector<16x324xf32>
    %c0_14 = arith.constant 0 : index
    %c0_15 = arith.constant 0 : index
    %10 = vector.load %arg7[%c0_14, %c0_15] : memref<16x1xf32, #tpu.memory_space<vmem>>, vector<16x1xf32>
    %11 = vector.broadcast %10 : vector<16x1xf32> to vector<16x324xf32>
    %12 = arith.addf %9, %11 : vector<16x324xf32>
    %cst_16 = arith.constant 0.000000e+00 : f32
    %13 = vector.broadcast %cst_16 : f32 to vector<16x324xf32>
    %14 = arith.maximumf %12, %13 : vector<16x324xf32>
    %15 = vector.broadcast %6 : vector<1x324xf32> to vector<16x324xf32>
    %16 = arith.mulf %14, %15 : vector<16x324xf32>
    %c0_17 = arith.constant 0 : index
    %c24 = arith.constant 24 : index
    %17 = vector.load %arg22[%c0_17, %c24] : memref<16x372xf32, #tpu.memory_space<vmem>>, vector<16x324xf32>
    tpu.vector_store %arg22[%c0_17, %c24], %16 {strides = array<i32>} : memref<16x372xf32, #tpu.memory_space<vmem>>, vector<16x324xf32>,
    %c0_18 = arith.constant 0 : index
    %c0_19 = arith.constant 0 : index
    %18 = vector.load %arg8[%c0_18, %c0_19] : memref<16x9xf32, #tpu.memory_space<vmem>>, vector<16x9xf32>
    %cst_20 = arith.constant 0.000000e+00 : f32
    %19 = vector.broadcast %cst_20 : f32 to vector<16x324xf32>
    %20 = vector.extract_strided_slice %18 {offsets = [0, 0], sizes = [16, 1], strides = [1, 1]} : vector<16x9xf32> to vector<16x1xf32>
    %c0_21 = arith.constant 0 : index
    %c5 = arith.constant 5 : index
    %21 = vector.load %arg22[%c0_21, %c5] : memref<16x372xf32, #tpu.memory_space<vmem>>, vector<16x324xf32>
    %22 = vector.broadcast %20 : vector<16x1xf32> to vector<16x324xf32>
    %23 = arith.mulf %22, %21 : vector<16x324xf32>
    %24 = arith.addf %19, %23 : vector<16x324xf32>
    %25 = vector.extract_strided_slice %18 {offsets = [0, 1], sizes = [16, 1], strides = [1, 1]} : vector<16x9xf32> to vector<16x1xf32>
    %c0_22 = arith.constant 0 : index
    %c6 = arith.constant 6 : index
    %26 = vector.load %arg22[%c0_22, %c6] : memref<16x372xf32, #tpu.memory_space<vmem>>, vector<16x324xf32>
    %27 = vector.broadcast %25 : vector<16x1xf32> to vector<16x324xf32>
    %28 = arith.mulf %27, %26 : vector<16x324xf32>
    %29 = arith.addf %24, %28 : vector<16x324xf32>
    %30 = vector.extract_strided_slice %18 {offsets = [0, 2], sizes = [16, 1], strides = [1, 1]} : vector<16x9xf32> to vector<16x1xf32>
    %c0_23 = arith.constant 0 : index
    %c7 = arith.constant 7 : index
    %31 = vector.load %arg22[%c0_23, %c7] : memref<16x372xf32, #tpu.memory_space<vmem>>, vector<16x324xf32>
    %32 = vector.broadcast %30 : vector<16x1xf32> to vector<16x324xf32>
    %33 = arith.mulf %32, %31 : vector<16x324xf32>
    %34 = arith.addf %29, %33 : vector<16x324xf32>
    %35 = vector.extract_strided_slice %18 {offsets = [0, 3], sizes = [16, 1], strides = [1, 1]} : vector<16x9xf32> to vector<16x1xf32>
    %c0_24 = arith.constant 0 : index
    %c23 = arith.constant 23 : index
    %36 = vector.load %arg22[%c0_24, %c23] : memref<16x372xf32, #tpu.memory_space<vmem>>, vector<16x324xf32>
    %37 = vector.broadcast %35 : vector<16x1xf32> to vector<16x324xf32>
    %38 = arith.mulf %37, %36 : vector<16x324xf32>
    %39 = arith.addf %34, %38 : vector<16x324xf32>
    %40 = vector.extract_strided_slice %18 {offsets = [0, 4], sizes = [16, 1], strides = [1, 1]} : vector<16x9xf32> to vector<16x1xf32>
    %c0_25 = arith.constant 0 : index
    %c24_26 = arith.constant 24 : index
    %41 = vector.load %arg22[%c0_25, %c24_26] : memref<16x372xf32, #tpu.memory_space<vmem>>, vector<16x324xf32>
    %42 = vector.broadcast %40 : vector<16x1xf32> to vector<16x324xf32>
    %43 = arith.mulf %42, %41 : vector<16x324xf32>
    %44 = arith.addf %39, %43 : vector<16x324xf32>
    %45 = vector.extract_strided_slice %18 {offsets = [0, 5], sizes = [16, 1], strides = [1, 1]} : vector<16x9xf32> to vector<16x1xf32>
    %c0_27 = arith.constant 0 : index
    %c25 = arith.constant 25 : index
    %46 = vector.load %arg22[%c0_27, %c25] : memref<16x372xf32, #tpu.memory_space<vmem>>, vector<16x324xf32>
    %47 = vector.broadcast %45 : vector<16x1xf32> to vector<16x324xf32>
    %48 = arith.mulf %47, %46 : vector<16x324xf32>
    %49 = arith.addf %44, %48 : vector<16x324xf32>
    %50 = vector.extract_strided_slice %18 {offsets = [0, 6], sizes = [16, 1], strides = [1, 1]} : vector<16x9xf32> to vector<16x1xf32>
    %c0_28 = arith.constant 0 : index
    %c41 = arith.constant 41 : index
    %51 = vector.load %arg22[%c0_28, %c41] : memref<16x372xf32, #tpu.memory_space<vmem>>, vector<16x324xf32>
    %52 = vector.broadcast %50 : vector<16x1xf32> to vector<16x324xf32>
    %53 = arith.mulf %52, %51 : vector<16x324xf32>
    %54 = arith.addf %49, %53 : vector<16x324xf32>
    %55 = vector.extract_strided_slice %18 {offsets = [0, 7], sizes = [16, 1], strides = [1, 1]} : vector<16x9xf32> to vector<16x1xf32>
    %c0_29 = arith.constant 0 : index
    %c42 = arith.constant 42 : index
    %56 = vector.load %arg22[%c0_29, %c42] : memref<16x372xf32, #tpu.memory_space<vmem>>, vector<16x324xf32>
    %57 = vector.broadcast %55 : vector<16x1xf32> to vector<16x324xf32>
    %58 = arith.mulf %57, %56 : vector<16x324xf32>
    %59 = arith.addf %54, %58 : vector<16x324xf32>
    %60 = vector.extract_strided_slice %18 {offsets = [0, 8], sizes = [16, 1], strides = [1, 1]} : vector<16x9xf32> to vector<16x1xf32>
    %c0_30 = arith.constant 0 : index
    %c43 = arith.constant 43 : index
    %61 = vector.load %arg22[%c0_30, %c43] : memref<16x372xf32, #tpu.memory_space<vmem>>, vector<16x324xf32>
    %62 = vector.broadcast %60 : vector<16x1xf32> to vector<16x324xf32>
    %63 = arith.mulf %62, %61 : vector<16x324xf32>
    %64 = arith.addf %59, %63 : vector<16x324xf32>
    %c0_31 = arith.constant 0 : index
    %c0_32 = arith.constant 0 : index
    %65 = vector.load %arg4[%c0_31, %c0_32] : memref<324x100xf32, #tpu.memory_space<vmem>>, vector<324x100xf32>
    %cst_33 = arith.constant dense<0.000000e+00> : vector<16x100xf32>
    %66 = tpu.matmul %64, %65, %cst_33 {dimension_numbers = #tpu.dot_dimension_numbers<[1], [0], [0], [1], [0, 0, 1, 1], [], []>} : vector<16x324xf32>, vector<324x100xf32>, vector<16x100xf32> -> vector<16x100xf32>
    %c0_34 = arith.constant 0 : index
    %c0_35 = arith.constant 0 : index
    %67 = vector.load %arg9[%c0_34, %c0_35] : memref<16x1xf32, #tpu.memory_space<vmem>>, vector<16x1xf32>
    %68 = vector.broadcast %67 : vector<16x1xf32> to vector<16x100xf32>
    %69 = arith.addf %66, %68 : vector<16x100xf32>
    %cst_36 = arith.constant 0.000000e+00 : f32
    %70 = vector.broadcast %cst_36 : f32 to vector<16x100xf32>
    %71 = arith.maximumf %69, %70 : vector<16x100xf32>
    %c0_37 = arith.constant 0 : index
    %c0_38 = arith.constant 0 : index
    %72 = vector.load %arg10[%c0_37, %c0_38] : memref<8x16xf32, #tpu.memory_space<vmem>>, vector<8x16xf32>
    %cst_39 = arith.constant dense<0.000000e+00> : vector<8x100xf32>
    %73 = tpu.matmul %72, %71, %cst_39 {dimension_numbers = #tpu.dot_dimension_numbers<[1], [0], [0], [1], [0, 0, 1, 1], [], []>} : vector<8x16xf32>, vector<16x100xf32>, vector<8x100xf32> -> vector<8x100xf32>
    %c0_40 = arith.constant 0 : index
    %c0_41 = arith.constant 0 : index
    %74 = vector.load %arg11[%c0_40, %c0_41] : memref<8x1xf32, #tpu.memory_space<vmem>>, vector<8x1xf32>
    %75 = vector.broadcast %74 : vector<8x1xf32> to vector<8x100xf32>
    %76 = arith.addf %73, %75 : vector<8x100xf32>
    %c0_42 = arith.constant 0 : index
    %c0_43 = arith.constant 0 : index
    %77 = vector.load %arg12[%c0_42, %c0_43] : memref<32x8xf32, #tpu.memory_space<vmem>>, vector<32x8xf32>
    %cst_44 = arith.constant dense<0.000000e+00> : vector<32x100xf32>
    %78 = tpu.matmul %77, %76, %cst_44 {dimension_numbers = #tpu.dot_dimension_numbers<[1], [0], [0], [1], [0, 0, 1, 1], [], []>} : vector<32x8xf32>, vector<8x100xf32>, vector<32x100xf32> -> vector<32x100xf32>
    %c0_45 = arith.constant 0 : index
    %c0_46 = arith.constant 0 : index
    %79 = vector.load %arg13[%c0_45, %c0_46] : memref<32x1xf32, #tpu.memory_space<vmem>>, vector<32x1xf32>
    %80 = vector.broadcast %79 : vector<32x1xf32> to vector<32x100xf32>
    %81 = arith.addf %78, %80 : vector<32x100xf32>
    %cst_47 = arith.constant 0.000000e+00 : f32
    %82 = vector.broadcast %cst_47 : f32 to vector<32x100xf32>
    %83 = arith.maximumf %81, %82 : vector<32x100xf32>
    %84 = vector.broadcast %7 : vector<1x100xf32> to vector<32x100xf32>
    %85 = arith.mulf %83, %84 : vector<32x100xf32>
    %c0_48 = arith.constant 0 : index
    %c16 = arith.constant 16 : index
    %86 = vector.load %arg23[%c0_48, %c16] : memref<32x132xf32, #tpu.memory_space<vmem>>, vector<32x100xf32>
    tpu.vector_store %arg23[%c0_48, %c16], %85 {strides = array<i32>} : memref<32x132xf32, #tpu.memory_space<vmem>>, vector<32x100xf32>,
    %c0_49 = arith.constant 0 : index
    %c0_50 = arith.constant 0 : index
    %87 = vector.load %arg14[%c0_49, %c0_50] : memref<32x9xf32, #tpu.memory_space<vmem>>, vector<32x9xf32>
    %cst_51 = arith.constant 0.000000e+00 : f32
    %88 = vector.broadcast %cst_51 : f32 to vector<32x100xf32>
    %89 = vector.extract_strided_slice %87 {offsets = [0, 0], sizes = [32, 1], strides = [1, 1]} : vector<32x9xf32> to vector<32x1xf32>
    %c0_52 = arith.constant 0 : index
    %c5_53 = arith.constant 5 : index
    %90 = vector.load %arg23[%c0_52, %c5_53] : memref<32x132xf32, #tpu.memory_space<vmem>>, vector<32x100xf32>
    %91 = vector.broadcast %89 : vector<32x1xf32> to vector<32x100xf32>
    %92 = arith.mulf %91, %90 : vector<32x100xf32>
    %93 = arith.addf %88, %92 : vector<32x100xf32>
    %94 = vector.extract_strided_slice %87 {offsets = [0, 1], sizes = [32, 1], strides = [1, 1]} : vector<32x9xf32> to vector<32x1xf32>
    %c0_54 = arith.constant 0 : index
    %c6_55 = arith.constant 6 : index
    %95 = vector.load %arg23[%c0_54, %c6_55] : memref<32x132xf32, #tpu.memory_space<vmem>>, vector<32x100xf32>
    %96 = vector.broadcast %94 : vector<32x1xf32> to vector<32x100xf32>
    %97 = arith.mulf %96, %95 : vector<32x100xf32>
    %98 = arith.addf %93, %97 : vector<32x100xf32>
    %99 = vector.extract_strided_slice %87 {offsets = [0, 2], sizes = [32, 1], strides = [1, 1]} : vector<32x9xf32> to vector<32x1xf32>
    %c0_56 = arith.constant 0 : index
    %c7_57 = arith.constant 7 : index
    %100 = vector.load %arg23[%c0_56, %c7_57] : memref<32x132xf32, #tpu.memory_space<vmem>>, vector<32x100xf32>
    %101 = vector.broadcast %99 : vector<32x1xf32> to vector<32x100xf32>
    %102 = arith.mulf %101, %100 : vector<32x100xf32>
    %103 = arith.addf %98, %102 : vector<32x100xf32>
    %104 = vector.extract_strided_slice %87 {offsets = [0, 3], sizes = [32, 1], strides = [1, 1]} : vector<32x9xf32> to vector<32x1xf32>
    %c0_58 = arith.constant 0 : index
    %c15 = arith.constant 15 : index
    %105 = vector.load %arg23[%c0_58, %c15] : memref<32x132xf32, #tpu.memory_space<vmem>>, vector<32x100xf32>
    %106 = vector.broadcast %104 : vector<32x1xf32> to vector<32x100xf32>
    %107 = arith.mulf %106, %105 : vector<32x100xf32>
    %108 = arith.addf %103, %107 : vector<32x100xf32>
    %109 = vector.extract_strided_slice %87 {offsets = [0, 4], sizes = [32, 1], strides = [1, 1]} : vector<32x9xf32> to vector<32x1xf32>
    %c0_59 = arith.constant 0 : index
    %c16_60 = arith.constant 16 : index
    %110 = vector.load %arg23[%c0_59, %c16_60] : memref<32x132xf32, #tpu.memory_space<vmem>>, vector<32x100xf32>
    %111 = vector.broadcast %109 : vector<32x1xf32> to vector<32x100xf32>
    %112 = arith.mulf %111, %110 : vector<32x100xf32>
    %113 = arith.addf %108, %112 : vector<32x100xf32>
    %114 = vector.extract_strided_slice %87 {offsets = [0, 5], sizes = [32, 1], strides = [1, 1]} : vector<32x9xf32> to vector<32x1xf32>
    %c0_61 = arith.constant 0 : index
    %c17 = arith.constant 17 : index
    %115 = vector.load %arg23[%c0_61, %c17] : memref<32x132xf32, #tpu.memory_space<vmem>>, vector<32x100xf32>
    %116 = vector.broadcast %114 : vector<32x1xf32> to vector<32x100xf32>
    %117 = arith.mulf %116, %115 : vector<32x100xf32>
    %118 = arith.addf %113, %117 : vector<32x100xf32>
    %119 = vector.extract_strided_slice %87 {offsets = [0, 6], sizes = [32, 1], strides = [1, 1]} : vector<32x9xf32> to vector<32x1xf32>
    %c0_62 = arith.constant 0 : index
    %c25_63 = arith.constant 25 : index
    %120 = vector.load %arg23[%c0_62, %c25_63] : memref<32x132xf32, #tpu.memory_space<vmem>>, vector<32x100xf32>
    %121 = vector.broadcast %119 : vector<32x1xf32> to vector<32x100xf32>
    %122 = arith.mulf %121, %120 : vector<32x100xf32>
    %123 = arith.addf %118, %122 : vector<32x100xf32>
    %124 = vector.extract_strided_slice %87 {offsets = [0, 7], sizes = [32, 1], strides = [1, 1]} : vector<32x9xf32> to vector<32x1xf32>
    %c0_64 = arith.constant 0 : index
    %c26 = arith.constant 26 : index
    %125 = vector.load %arg23[%c0_64, %c26] : memref<32x132xf32, #tpu.memory_space<vmem>>, vector<32x100xf32>
    %126 = vector.broadcast %124 : vector<32x1xf32> to vector<32x100xf32>
    %127 = arith.mulf %126, %125 : vector<32x100xf32>
    %128 = arith.addf %123, %127 : vector<32x100xf32>
    %129 = vector.extract_strided_slice %87 {offsets = [0, 8], sizes = [32, 1], strides = [1, 1]} : vector<32x9xf32> to vector<32x1xf32>
    %c0_65 = arith.constant 0 : index
    %c27 = arith.constant 27 : index
    %130 = vector.load %arg23[%c0_65, %c27] : memref<32x132xf32, #tpu.memory_space<vmem>>, vector<32x100xf32>
    %131 = vector.broadcast %129 : vector<32x1xf32> to vector<32x100xf32>
    %132 = arith.mulf %131, %130 : vector<32x100xf32>
    %133 = arith.addf %128, %132 : vector<32x100xf32>
    %c0_66 = arith.constant 0 : index
    %c0_67 = arith.constant 0 : index
    %134 = vector.load %arg15[%c0_66, %c0_67] : memref<32x1xf32, #tpu.memory_space<vmem>>, vector<32x1xf32>
    %135 = vector.broadcast %134 : vector<32x1xf32> to vector<32x100xf32>
    %136 = arith.addf %133, %135 : vector<32x100xf32>
    %cst_68 = arith.constant 0.000000e+00 : f32
    %137 = vector.broadcast %cst_68 : f32 to vector<32x100xf32>
    %138 = arith.maximumf %136, %137 : vector<32x100xf32>
    %c0_69 = arith.constant 0 : index
    %c0_70 = arith.constant 0 : index
    %139 = vector.load %arg16[%c0_69, %c0_70] : memref<8x32xf32, #tpu.memory_space<vmem>>, vector<8x32xf32>
    %cst_71 = arith.constant dense<0.000000e+00> : vector<8x100xf32>
    %140 = tpu.matmul %139, %138, %cst_71 {dimension_numbers = #tpu.dot_dimension_numbers<[1], [0], [0], [1], [0, 0, 1, 1], [], []>} : vector<8x32xf32>, vector<32x100xf32>, vector<8x100xf32> -> vector<8x100xf32>
    %141 = arith.addf %76, %140 : vector<8x100xf32>
    %c0_72 = arith.constant 0 : index
    %c0_73 = arith.constant 0 : index
    %142 = vector.load %arg17[%c0_72, %c0_73] : memref<8x1xf32, #tpu.memory_space<vmem>>, vector<8x1xf32>
    %143 = vector.broadcast %142 : vector<8x1xf32> to vector<8x100xf32>
    %144 = arith.addf %141, %143 : vector<8x100xf32>
    %c0_74 = arith.constant 0 : index
    %c0_75 = arith.constant 0 : index
    %145 = vector.load %arg5[%c0_74, %c0_75] : memref<100x64xf32, #tpu.memory_space<vmem>>, vector<100x64xf32>
    %cst_76 = arith.constant dense<0.000000e+00> : vector<8x64xf32>
    %146 = tpu.matmul %144, %145, %cst_76 {dimension_numbers = #tpu.dot_dimension_numbers<[1], [0], [0], [1], [0, 0, 1, 1], [], []>} : vector<8x100xf32>, vector<100x64xf32>, vector<8x64xf32> -> vector<8x64xf32>
    %c0_77 = arith.constant 0 : index
    %c0_78 = arith.constant 0 : index
    %c0_79 = arith.constant 0 : index
    %147 = vector.load %arg20[%c0_77, %c0_78, %c0_79] : memref<1x8x64xf32, #tpu.memory_space<vmem>>, vector<1x8x64xf32>
    %148 = vector.shape_cast %147 : vector<1x8x64xf32> to vector<8x64xf32>
    %149 = vector.shape_cast %146 : vector<8x64xf32> to vector<1x8x64xf32>
    tpu.vector_store %arg20[%c0_77, %c0_78, %c0_79], %149 {strides = array<i32>} : memref<1x8x64xf32, #tpu.memory_space<vmem>>, vector<1x8x64xf32>,
    %c0_80 = arith.constant 0 : index
    %c0_81 = arith.constant 0 : index
    %150 = vector.load %arg18[%c0_80, %c0_81] : memref<8x8xf32, #tpu.memory_space<vmem>>, vector<8x8xf32>
    %cst_82 = arith.constant dense<0.000000e+00> : vector<8x100xf32>
    %151 = tpu.matmul %150, %144, %cst_82 {dimension_numbers = #tpu.dot_dimension_numbers<[1], [0], [0], [1], [0, 0, 1, 1], [], []>} : vector<8x8xf32>, vector<8x100xf32>, vector<8x100xf32> -> vector<8x100xf32>
    %c0_83 = arith.constant 0 : index
    %c0_84 = arith.constant 0 : index
    %152 = vector.load %arg19[%c0_83, %c0_84] : memref<8x1xf32, #tpu.memory_space<vmem>>, vector<8x1xf32>
    %153 = vector.broadcast %152 : vector<8x1xf32> to vector<8x100xf32>
    %154 = arith.addf %151, %153 : vector<8x100xf32>
    %cst_85 = arith.constant dense<0.000000e+00> : vector<8x64xf32>
    %155 = tpu.matmul %154, %145, %cst_85 {dimension_numbers = #tpu.dot_dimension_numbers<[1], [0], [0], [1], [0, 0, 1, 1], [], []>} : vector<8x100xf32>, vector<100x64xf32>, vector<8x64xf32> -> vector<8x64xf32>
    %c0_86 = arith.constant 0 : index
    %c0_87 = arith.constant 0 : index
    %c0_88 = arith.constant 0 : index
    %156 = vector.load %arg21[%c0_86, %c0_87, %c0_88] : memref<1x8x64xf32, #tpu.memory_space<vmem>>, vector<1x8x64xf32>
    %157 = vector.shape_cast %156 : vector<1x8x64xf32> to vector<8x64xf32>
    %158 = vector.shape_cast %155 : vector<8x64xf32> to vector<1x8x64xf32>
    tpu.vector_store %arg21[%c0_86, %c0_87, %c0_88], %158 {strides = array<i32>} : memref<1x8x64xf32, #tpu.memory_space<vmem>>, vector<1x8x64xf32>,
    return
  }
  func.func @transform_0(%arg0: i32) -> (i32, i32, i32) {
    %c0_i32 = arith.constant 0 : i32
    %c0_i32_0 = arith.constant 0 : i32
    %c0_i32_1 = arith.constant 0 : i32
    return %arg0, %c0_i32, %c0_i32_0 : i32, i32, i32
  }
  func.func @transform_1(%arg0: i32) -> (i32, i32) {
    %c0_i32 = arith.constant 0 : i32
    %c0_i32_0 = arith.constant 0 : i32
    %c0_i32_1 = arith.constant 0 : i32
    return %c0_i32, %c0_i32_0 : i32, i32
  }
  func.func @transform_2(%arg0: i32) -> (i32, i32) {
    %c0_i32 = arith.constant 0 : i32
    %c0_i32_0 = arith.constant 0 : i32
    %c0_i32_1 = arith.constant 0 : i32
    return %c0_i32, %c0_i32_0 : i32, i32
  }
  func.func @transform_3(%arg0: i32) -> (i32, i32) {
    %c0_i32 = arith.constant 0 : i32
    %c0_i32_0 = arith.constant 0 : i32
    %c0_i32_1 = arith.constant 0 : i32
    return %c0_i32, %c0_i32_0 : i32, i32
  }
  func.func @transform_4(%arg0: i32) -> (i32, i32) {
    %c0_i32 = arith.constant 0 : i32
    %c0_i32_0 = arith.constant 0 : i32
    %c0_i32_1 = arith.constant 0 : i32
    return %c0_i32, %c0_i32_0 : i32, i32
  }
  func.func @transform_5(%arg0: i32) -> (i32, i32) {
    %c0_i32 = arith.constant 0 : i32
    %c0_i32_0 = arith.constant 0 : i32
    %c0_i32_1 = arith.constant 0 : i32
    return %c0_i32, %c0_i32_0 : i32, i32
  }
  func.func @transform_6(%arg0: i32) -> (i32, i32) {
    %c0_i32 = arith.constant 0 : i32
    %c0_i32_0 = arith.constant 0 : i32
    %c0_i32_1 = arith.constant 0 : i32
    return %c0_i32, %c0_i32_0 : i32, i32
  }
  func.func @transform_7(%arg0: i32) -> (i32, i32) {
    %c0_i32 = arith.constant 0 : i32
    %c0_i32_0 = arith.constant 0 : i32
    %c0_i32_1 = arith.constant 0 : i32
    return %c0_i32, %c0_i32_0 : i32, i32
  }
  func.func @transform_8(%arg0: i32) -> (i32, i32) {
    %c0_i32 = arith.constant 0 : i32
    %c0_i32_0 = arith.constant 0 : i32
    %c0_i32_1 = arith.constant 0 : i32
    return %c0_i32, %c0_i32_0 : i32, i32
  }
  func.func @transform_9(%arg0: i32) -> (i32, i32) {
    %c0_i32 = arith.constant 0 : i32
    %c0_i32_0 = arith.constant 0 : i32
    %c0_i32_1 = arith.constant 0 : i32
    return %c0_i32, %c0_i32_0 : i32, i32
  }
  func.func @transform_10(%arg0: i32) -> (i32, i32) {
    %c0_i32 = arith.constant 0 : i32
    %c0_i32_0 = arith.constant 0 : i32
    %c0_i32_1 = arith.constant 0 : i32
    return %c0_i32, %c0_i32_0 : i32, i32
  }
  func.func @transform_11(%arg0: i32) -> (i32, i32) {
    %c0_i32 = arith.constant 0 : i32
    %c0_i32_0 = arith.constant 0 : i32
    %c0_i32_1 = arith.constant 0 : i32
    return %c0_i32, %c0_i32_0 : i32, i32
  }
  func.func @transform_12(%arg0: i32) -> (i32, i32) {
    %c0_i32 = arith.constant 0 : i32
    %c0_i32_0 = arith.constant 0 : i32
    %c0_i32_1 = arith.constant 0 : i32
    return %c0_i32, %c0_i32_0 : i32, i32
  }
  func.func @transform_13(%arg0: i32) -> (i32, i32) {
    %c0_i32 = arith.constant 0 : i32
    %c0_i32_0 = arith.constant 0 : i32
    %c0_i32_1 = arith.constant 0 : i32
    return %c0_i32, %c0_i32_0 : i32, i32
  }
  func.func @transform_14(%arg0: i32) -> (i32, i32) {
    %c0_i32 = arith.constant 0 : i32
    %c0_i32_0 = arith.constant 0 : i32
    %c0_i32_1 = arith.constant 0 : i32
    return %c0_i32, %c0_i32_0 : i32, i32
  }
  func.func @transform_15(%arg0: i32) -> (i32, i32) {
    %c0_i32 = arith.constant 0 : i32
    %c0_i32_0 = arith.constant 0 : i32
    %c0_i32_1 = arith.constant 0 : i32
    return %c0_i32, %c0_i32_0 : i32, i32
  }
  func.func @transform_16(%arg0: i32) -> (i32, i32) {
    %c0_i32 = arith.constant 0 : i32
    %c0_i32_0 = arith.constant 0 : i32
    %c0_i32_1 = arith.constant 0 : i32
    return %c0_i32, %c0_i32_0 : i32, i32
  }
  func.func @transform_17(%arg0: i32) -> (i32, i32) {
    %c0_i32 = arith.constant 0 : i32
    %c0_i32_0 = arith.constant 0 : i32
    %c0_i32_1 = arith.constant 0 : i32
    return %c0_i32, %c0_i32_0 : i32, i32
  }
  func.func @transform_18(%arg0: i32) -> (i32, i32) {
    %c0_i32 = arith.constant 0 : i32
    %c0_i32_0 = arith.constant 0 : i32
    %c0_i32_1 = arith.constant 0 : i32
    return %c0_i32, %c0_i32_0 : i32, i32
  }
  func.func @transform_19(%arg0: i32) -> (i32, i32, i32) {
    %c0_i32 = arith.constant 0 : i32
    %c0_i32_0 = arith.constant 0 : i32
    %c0_i32_1 = arith.constant 0 : i32
    return %arg0, %c0_i32, %c0_i32_0 : i32, i32, i32
  }
  func.func @transform_20(%arg0: i32) -> (i32, i32, i32) {
    %c0_i32 = arith.constant 0 : i32
    %c0_i32_0 = arith.constant 0 : i32
    %c0_i32_1 = arith.constant 0 : i32
    return %arg0, %c0_i32, %c0_i32_0 : i32, i32, i32
  }
}

</mosaic_0001>

<bundles_post_ra>
// kernel: encoder_block_forward.1
= control target key start
LH: loop header
LB: loop body
LE: loop exit
PB: predicated region body
PF: predicated region fallthrough
CT: control target
= control target key end

     0   :  { %s4041_s0 = inlined_call_operand.vmem [shape: f32[2,4,324], index: 0, kind: input, shape index: {}]   ;;  %s4042_s1 = inlined_call_operand.vmem [shape: f32[1,324], index: 1, kind: input, shape index: {}]   ;;  %s4043_s2 = inlined_call_operand.vmem [shape: f32[1,100], index: 2, kind: input, shape index: {}]   ;;  %s4044_s3 = inlined_call_operand.vmem [shape: f32[324,100], index: 3, kind: input, shape index: {}]   ;;  %s4045_s4 = inlined_call_operand.vmem [shape: f32[100,64], index: 4, kind: input, shape index: {}]   ;;  %s4046_s5 = inlined_call_operand.vmem [shape: f32[16,4], index: 5, kind: input, shape index: {}]   ;;  %s4047_s6 = inlined_call_operand.vmem [shape: f32[16,1], index: 6, kind: input, shape index: {}]   ;;  %s4048_s7 = inlined_call_operand.vmem [shape: f32[16,9], index: 7, kind: input, shape index: {}]   ;;  %s4049_s8 = inlined_call_operand.vmem [shape: f32[16,1], index: 8, kind: input, shape index: {}]   ;;  %s4050_s9 = inlined_call_operand.vmem [shape: f32[8,16], index: 9, kind: input, shape index: {}]   ;;  %s4051_s10 = inlined_call_operand.vmem [shape: f32[8,1], index: 10, kind: input, shape index: {}]   ;;  %s4052_s11 = inlined_call_operand.vmem [shape: f32[32,8], index: 11, kind: input, shape index: {}]   ;;  %s4053_s12 = inlined_call_operand.vmem [shape: f32[32,1], index: 12, kind: input, shape index: {}]   ;;  %s4054_s13 = inlined_call_operand.vmem [shape: f32[32,9], index: 13, kind: input, shape index: {}]   ;;  %s4055_s14 = inlined_call_operand.vmem [shape: f32[32,1], index: 14, kind: input, shape index: {}]   ;;  %s4056_s15 = inlined_call_operand.vmem [shape: f32[8,32], index: 15, kind: input, shape index: {}]   ;;  %s4057_s16 = inlined_call_operand.vmem [shape: f32[8,1], index: 16, kind: input, shape index: {}]   ;;  %s4058_s17 = inlined_call_operand.vmem [shape: f32[8,8], index: 17, kind: input, shape index: {}]   ;;  %s4059_s18 = inlined_call_operand.vmem [shape: f32[8,1], index: 18, kind: input, shape index: {}]   ;;  %s4060_s19 = inlined_call_operand.vmem [shape: f32[2,8,64], index: 19, kind: output, shape index: {0}]   ;;  %s4061_s20 = inlined_call_operand.vmem [shape: f32[2,8,64], index: 20, kind: output, shape index: {1}]  }
   0x1   :  { %4068 = sst [smem:[#allocation4_spill]] %s4041_s0 }
   0x2   :  { %4069 = sst [smem:[#allocation5_spill]] %s4042_s1  ;;  %s3204_s1 = smov 0  }
   0x3   :  { %4070 = sst [smem:[#allocation6_spill]] %s4043_s2 }
   0x4   :  { %4071 = sst [smem:[#allocation7_spill]] %s4044_s3 }
   0x5   :  { %4072 = sst [smem:[#allocation8_spill]] %s4045_s4 }
   0x6 LB: > { %s2626_s22 = sadd.s32 4294967295, %s3069_s1   ;;  %p2630_p0 = scmp.ge.s32.totalorder %s3069_s1, 1  ;;  %s3069_s1 = sphi %s3204_s1, %s31_s1  }
   0x7   : > { %p565_p1 = scmp.lt.s32.totalorder %s3069_s1, 3 }
   0x9   : > { %p566_p2 = pnand %p2630_p0, %p565_p1 }
   0xa   : > { %p3212_p3 = scmp.lt.s32.totalorder (!%p566_p2), %s2626_s22, 1  ;;  %vm647_vm0 = vcmask (!%p566_p2), 31744   ;;  %v659_v0 = vld [vmem:[%s4046_s5] sm:$0xff] (!%p566_p2)  ;;  %v3071_v1 = vmov (!%p566_p2), 0.0   ;;  %v3072_v4 = vmov (!%p566_p2), 0   ;;  %v3073_v5 = vmov (!%p566_p2), 1  }
   0xb   : > { %569 = sbr.rel (%p566_p2) target bundleno = 2439 (0x987), region = 96  ;;  %2755 = vmatprep.mubr.msk.f32.mxu1 (!%p566_p2), %vm647_vm0, %v659_v0  ;;  %639 = vst [vmem:[#allocation2] sm:$0xff] (!%p566_p2), %v3071_v1  ;;  %643 = vst [vmem:[#allocation2 + $0x18] sm:$0xff] (!%p566_p2), %v3071_v1  ;;  %753 = vmatprep.mubr.f32.mxu0 (!%p566_p2), %v3071_v1  ;;  %v661_v2 = vld [vmem:[%s4047_s6] sm:$0xff] (!%p566_p2)  ;;  %v662_v6 = vld [vmem:[%s4047_s6 + $0x8] sm:$0xff] (!%p566_p2)  ;;  %vm682_vm1 = vcmask (!%p566_p2), 1043456   ;;  %v848_v19 = vlaneseq (!%p566_p2) }
   0xc   : > { %646 = vst [vmem:[#allocation3] sm:$0xff] (!%p566_p2), %v3071_v1  ;;  %649 = vst [vmem:[#allocation3 + $0x10] sm:$0xff] (!%p566_p2), %v3071_v1  ;;  %v906_v3 = vld [vmem:[%s4048_s7] sm:$0xff] (!%p566_p2)  ;;  %2998 = vset.pattern.permute.xlu0 (!%p566_p2), %v3072_v4  ;;  %2999 = vset.pattern.permute.xlu1 (!%p566_p2), %v3073_v5  ;;  %s4074_s21 = sld [smem:[#allocation4_spill]] (!%p566_p2)  ;;  %v660_v9 = vld [vmem:[%s4046_s5 + $0x8] sm:$0xff] (!%p566_p2)  ;;  %v3074_v10 = vmov (!%p566_p2), 2  }
   0xd   : > { %651 = vst [vmem:[#allocation3 + $0x20] sm:$0xff] (!%p566_p2), %v3071_v1  ;;  %653 = vst [vmem:[#allocation3 + $0x30] sm:$0xff] (!%p566_p2), %v3071_v1  ;;  %665 = vperm.xlu0 (!%p566_p2), %2998, %v661_v2   ;;  %937 = vperm.xlu1 (!%p566_p2), %2999, %v906_v3   ;;  %v3075_v12 = vmov (!%p566_p2), 3   ;;  %v907_v13 = vld [vmem:[%s4048_s7 + $0x8] sm:$0xff] (!%p566_p2)  ;;  %v3076_v14 = vmov (!%p566_p2), 4   ;;  %v3077_v15 = vmov (!%p566_p2), 5  }
   0xe   : > { %v3078_v16 = vmov (!%p566_p2), 6   ;;  %v3079_v17 = vmov (!%p566_p2), 8   ;;  %v3080_v18 = vmov (!%p566_p2), 7   ;;  %v849_v21 = vshrl.u32 (!%p566_p2), %v848_v19, 7  ;;  %s3081_s4 = smov (!%p566_p2), 24   ;;  %s4066_s29 = smov (!%p566_p2), 126  }
   0xf   : > { %vm641_vm2 = vcmask (!%p566_p2), 949248   ;;  %vm898_vm3 = vcmask (!%p566_p2), 1047744   ;;  %vm887_vm4 = vcmask (!%p566_p2), 195584   ;;  %vm901_vm5 = vcmask (!%p566_p2), 752640   ;;  %s3083_s30 = smov (!%p566_p2), 127   ;;  %s3084_s0 = smov (!%p566_p2), 110  }
  0x10   : > { %v858_v22 = vsub.s32 (!%p566_p2), 2, %v849_v21  ;;  %642 = vst.msk [vmem:[#allocation2 + $0x10] sm:$0xff] (!%p566_p2), %vm641_vm2, %v3071_v1  ;;  %645 = vst.msk [vmem:[#allocation2 + $0x28] sm:$0xff] (!%p566_p2), %vm641_vm2, %v3071_v1  ;;  %v850_v25 = vsub.s32 (!%p566_p2), 0, %v849_v21  ;;  %v854_v36 = vsub.s32 (!%p566_p2), 1, %v849_v21  ;;  %s3087_s24 = smov (!%p566_p2), 92  }
  0x11   : > { %670 = vperm.xlu0 (!%p566_p2), %2998, %v662_v6   ;;  %3000 = vset.pattern.permute.xlu1 (!%p566_p2), %v3074_v10  ;;  %s3088_s2 = smov (!%p566_p2), 91   ;;  %s3089_s25 = smov (!%p566_p2), 90   ;;  %vm968_vm6 = vcmask (!%p566_p2), 1039360   ;;  %vm1017_vm7 = vcmask (!%p566_p2), 1031168   ;;  %vm1066_vm8 = vcmask (!%p566_p2), 900096   ;;  %vm1115_vm9 = vcmask (!%p566_p2), 891904  }
  0x12   : > { %s4082_s22 = smov (!%p3212_p3, %s2626_s22), 1  ;;  %986 = vperm.xlu1 %3000, %v906_v3   ;;  %s4076_s27 = sld [smem:[#allocation7_spill]]  ;;  %vm1164_vm10 = vcmask 883712   ;;  %vm1261_vm11 = vcmask 744448   ;;  %vm1310_vm12 = vcmask 736256   ;;  %vm1407_vm13 = vcmask 556032  }
  0x13   : > { %s2961_s28 = smul.u32 12, %s4082_s22  ;;  %vm1398_vm14 = vcmask 1006592   ;;  %vm3092_vm15 = vmmov 0   ;;  %vm1676_vm2 = vcmask 64512   ;;  %s4077_s3 = sld [smem:[#allocation6_spill]] }
  0x14   : > { %s3093_s26 = smov 16  }
  0x15   : > { %s630_s23 = scalar_lea.vmem %s4074_s21, %s2961_s28  ;;  %3001 = vset.pattern.permute.xlu0 %v3073_v5  ;;  %s4075_s28 = sld [smem:[#allocation5_spill]] }
  0x16   : > { %v656_v7 = vld [vmem:[%s630_s23 + $0x8] sm:$0xf]  ;;  %v655_v8 = vld [vmem:[%s630_s23] sm:$0xff]  ;;  %3002 = vset.pattern.permute.xlu1 %v3075_v12  ;;  %941 = vperm.xlu0 %3001, %v907_v13   ;;  %s3085_s21 = smov 109   ;;  %s4064_s23 = smov 108  }
  0x17   : > { %2753 = vmatprep.subr.msk.mxu1 %vm682_vm1, %v656_v7  ;;  %v675_v11 = vcombine.high %v655_v8, %v655_v8  ;;  %1035 = vperm.xlu1 %3002, %v906_v3  }
  0x18   : > { %2754 = vmatpush3.msk.msra.mxu1 %vm682_vm1, %v656_v7 }
  0x19   : > { %2634 = vmatprep.subr.msk.mxu0 %vm682_vm1, %v675_v11  ;;  %2756 = vmatmul.mubr.msk.f32.vlgmr.msra.gmra.mrb[0].mxu1 %vm647_vm0, %v660_v9 }
  0x1a   : > { %2635 = vmatpush1.msk.msra.mxu0 %vm682_vm1, %v655_v8  ;;  %3004 = vset.pattern.permute.xlu0 %v3076_v14 }
  0x1b   : > { %2636 = vmatmul.mubr.msk.f32.vlgmr.msra.gmra.mrb[0].mxu0 %vm647_vm0, %v659_v0  ;;  %3003 = vset.pattern.permute.xlu1 %v3074_v10  ;;  %v657_v24 = vld [vmem:[%s4075_s28] sm:$0x7]  ;;  %s3095_s28 = smov 117  }
  0x1c   : > { %759 = vmatprep.mubr.f32.mxu0 %v3071_v1  ;;  %990 = vperm.xlu1 %3003, %v907_v13   ;;  %v859_v28 = vrot.slane %v657_v24, %v858_v22  ;;  %v851_v34 = vrot.slane %v657_v24, %v850_v25  ;;  %v855_v44 = vrot.slane %v657_v24, %v854_v36 }
  0x1d   : > { %1084 = vperm.xlu0 %3004, %v906_v3  }
  0x1f   : > { %2637 = vmatmul.mubr.msk.f32.gmra.mrb[2].mxu0 %vm647_vm0, %v660_v9  ;;  %vm1574_vm0 = vcmask 130048  }
  0x20   : > { %3005 = vset.pattern.permute.xlu1 %v3075_v12 }
  0x21   : > { %1039 = vperm.xlu1 %3005, %v907_v13   ;;  %1088 = vperm.xlu0 %3004, %v907_v13  }
  0x25   : > { %3006 = vset.pattern.permute.xlu1 %v3077_v15  ;;  %3008 = vset.pattern.permute.xlu0 %v3077_v15 }
  0x26   : > { %1133 = vperm.xlu1 %3006, %v906_v3   ;;  %1137 = vperm.xlu0 %3008, %v907_v13  }
  0x2a   : > { %3007 = vset.pattern.permute.xlu1 %v3078_v16  ;;  %3011 = vset.pattern.permute.xlu0 %v3079_v17 }
  0x2b   : > { %1182 = vperm.xlu1 %3007, %v906_v3   ;;  %1279 = vperm.xlu0 %3011, %v906_v3  }
  0x2f   : > { %3009 = vset.pattern.permute.xlu1 %v3080_v18  ;;  %3014 = vset.pattern.permute.xlu0 %v3072_v4 }
  0x30   : > { %1230 = vperm.xlu1 %3009, %v906_v3   ;;  %916 = vperm.xlu0 %3014, %v906_v3  }
  0x34   : > { %3010 = vset.pattern.permute.xlu1 %v3078_v16 }
  0x35   : > { %1186 = vperm.xlu1 %3010, %v907_v13  }
  0x39   : > { %3012 = vset.pattern.permute.xlu1 %v3080_v18 }
  0x3a   : > { %1234 = vperm.xlu1 %3012, %v907_v13  }
  0x3e   : > { %3013 = vset.pattern.permute.xlu1 %v3079_v17 }
  0x3f   : > { %1283 = vperm.xlu1 %3013, %v907_v13  }
  0x43   : > { %3015 = vset.pattern.permute.xlu1 %v3072_v4 }
  0x44   : > { %921 = vperm.xlu1 %3015, %v907_v13  }
  0x8c   : > { %v666_v20 = vpop.permute.xlu0 %665  ;;  %v3281_v54 = vpop.permute.xlu1 %937 }
  0x90   : > { %v671_v23 = vpop.permute.xlu0 %670 }
  0x91   : > { %v3283_v55 = vpop.permute.xlu1 %986 }
  0x95   : > { %v3295_v61 = vpop.permute.xlu0 %941 }
  0x96   : > { %v3285_v56 = vpop.permute.xlu1 %1035 }
  0x9b   : > { %v3287_v57 = vpop.permute.xlu1 %990 }
  0x9c   : > { %v3299_v63 = vpop.permute.xlu0 %1084 }
  0xa0   : > { %v3289_v58 = vpop.permute.xlu1 %1039  ;;  %v3303_v1 = vpop.permute.xlu0 %1088 }
  0xa5   : > { %v3291_v59 = vpop.permute.xlu1 %1133  ;;  %v3305_v2 = vpop.permute.xlu0 %1137 }
  0xaa   : > { %v3293_v60 = vpop.permute.xlu1 %1182  ;;  %v3309_v6 = vpop.permute.xlu0 %1279 }
  0xaf   : > { %v3297_v62 = vpop.permute.xlu1 %1230  ;;  %v3313_v8 = vpop.permute.xlu0 %916 }
  0xb4   : > { %v3301_v0 = vpop.permute.xlu1 %1186 }
  0xb9   : > { %v3307_v3 = vpop.permute.xlu1 %1234 }
  0xbe   : > { %v3311_v7 = vpop.permute.xlu1 %1283 }
  0xc3   : > { %v3315_v9 = vpop.permute.xlu1 %921 }
  0xec   : > { %v2757_v26 = vpop.f32.mrb[0].mxu1 }
  0xed   : > { %v838_v27 = vadd.f32 %v2757_v26, %v671_v23  ;;  %v832_v29 = vpop.f32.mrb[1].mxu1 }
  0xee   : > { %v755_v30 = vpop.f32.mrb[0].mxu0  ;;  %v833_v31 = vadd.f32 %v832_v29, %v666_v20 }
  0xef   : > { %v846_v32 = vmax.f32 %v838_v27, 0.0  ;;  %v756_v33 = vadd.f32 %v755_v30, %v666_v20  ;;  %v757_v35 = vpop.f32.mrb[1].mxu0 }
  0xf0   : > { %v758_v37 = vadd.f32 %v757_v35, %v666_v20  ;;  %v843_v40 = vmax.f32 %v833_v31, 0.0 }
  0xf1   : > { %v868_v38 = vmul.f32 %v859_v28, %v846_v32  ;;  %v841_v39 = vmax.f32 %v756_v33, 0.0 }
  0xf2   : > { %v761_v41 = vpop.f32.mrb[2].mxu0  ;;  %v842_v43 = vmax.f32 %v758_v37, 0.0  ;;  %v865_v48 = vmul.f32 %v859_v28, %v843_v40 }
  0xf3   : > { %v863_v42 = vmul.f32 %v851_v34, %v841_v39  ;;  %v762_v45 = vadd.f32 %v761_v41, %v671_v23  ;;  %885 = vrot.lane.b32.xlu0 %v868_v38, %s3081_s4  ;;  %v763_v46 = vpop.f32.mrb[3].mxu0 }
  0xf4   : > { %v764_v47 = vadd.f32 %v763_v46, %v671_v23  ;;  %v864_v50 = vmul.f32 %v855_v44, %v842_v43 }
  0xf5   : > { %v844_v49 = vmax.f32 %v762_v45, 0.0  ;;  %875 = vrot.lane.b32.xlu1 %v863_v42, %s3081_s4 }
  0xf6   : > { %v845_v51 = vmax.f32 %v764_v47, 0.0 }
  0xf7   : > { %879 = vrot.lane.b32.xlu0 %v865_v48, %s3081_s4  ;;  %v866_v52 = vmul.f32 %v851_v34, %v844_v49 }
  0xf8   : > { %v867_v53 = vmul.f32 %v855_v44, %v845_v51 }
  0xf9   : > { %877 = vrot.lane.b32.xlu1 %v864_v50, %s3081_s4 }
  0xfb   : > { %881 = vrot.lane.b32.xlu0 %v866_v52, %s3081_s4 }
  0xfd   : > { %883 = vrot.lane.b32.xlu1 %v867_v53, %s3081_s4  ;;  %s3096_s4 = smov 116  }
 0x165   : > { %v886_v11 = vpop.permute.xlu0 %885 }
 0x167   : > { %v876_v13 = vpop.permute.xlu1 %875 }
 0x168   : > { %899 = vst.msk [vmem:[#allocation2] sm:$0xff] %vm898_vm3, %v876_v13 }
 0x169   : > { %v880_v19 = vpop.permute.xlu0 %879 }
 0x16b   : > { %v878_v20 = vpop.permute.xlu1 %877 }
 0x16c   : > { %v3317_v21 = vsel %vm887_vm4, %v876_v13, %v878_v20  ;;  %v889_v22 = vsel %vm887_vm4, %v878_v20, %v880_v19 }
 0x16d   : > { %902 = vst.msk [vmem:[#allocation2 + $0x10] sm:$0xff] %vm901_vm5, %v889_v22  ;;  %v882_v23 = vpop.permute.xlu0 %881  ;;  %v945_v31 = vmul.f32 %v3281_v54, %v3317_v21  ;;  %v1043_v36 = vmul.f32 %v3285_v56, %v3317_v21  ;;  %v1092_v38 = vmul.f32 %v3299_v63, %v3317_v21  ;;  %v1141_v40 = vmul.f32 %v3291_v59, %v3317_v21 }
 0x16e   : > { %903 = vst.msk [vmem:[#allocation2 + $0x18] sm:$0xff] %vm898_vm3, %v882_v23  ;;  %v1190_v42 = vmul.f32 %v3293_v60, %v3317_v21  ;;  %v1238_v44 = vmul.f32 %v3297_v62, %v3317_v21  ;;  %v994_v45 = vmul.f32 %v3283_v55, %v3317_v21  ;;  %v1287_v46 = vmul.f32 %v3309_v6, %v3317_v21 }
 0x16f   : > { %v884_v24 = vpop.permute.xlu1 %883  ;;  %v3320_v25 = vld [vmem:[#allocation2] sm:$0xff]  ;;  %vm1804_vm3 = vcmask 949376  }
 0x170   : > { %v3322_v26 = vsel %vm887_vm4, %v882_v23, %v884_v24  ;;  %v891_v27 = vsel %vm887_vm4, %v884_v24, %v886_v11  ;;  %v993_v28 = vmul.f32 %v3283_v55, %v3320_v25  ;;  %v944_v29 = vmul.f32 %v3281_v54, %v3320_v25 }
 0x171   : > { %905 = vst.msk [vmem:[#allocation2 + $0x28] sm:$0xff] %vm901_vm5, %v891_v27  ;;  %v1042_v30 = vmul.f32 %v3285_v56, %v3320_v25  ;;  %v1091_v33 = vmul.f32 %v3299_v63, %v3320_v25  ;;  %v1140_v35 = vmul.f32 %v3291_v59, %v3320_v25  ;;  %v1189_v37 = vmul.f32 %v3293_v60, %v3320_v25 }
 0x172   : > { %1005 = vrot.lane.b32.xlu0 %v993_v28, %s4066_s29  ;;  %956 = vrot.lane.b32.xlu1 %v944_v29, %s3083_s30  ;;  %v1237_v39 = vmul.f32 %v3297_v62, %v3320_v25  ;;  %v1286_v41 = vmul.f32 %v3309_v6, %v3320_v25  ;;  %v948_v19 = vmul.f32 %v3295_v61, %v3322_v26  ;;  %vm2214_vm4 = vcmask 261120  }
 0x173   : > { %v997_v22 = vmul.f32 %v3287_v57, %v3322_v26  ;;  %v1290_v29 = vmul.f32 %v3311_v7, %v3322_v26 }
 0x174   : > { %v3335_v32 = vld [vmem:[#allocation2 + $0x10] sm:$0xff] }
 0x175   : > { %v995_v34 = vmul.f32 %v3283_v55, %v3335_v32  ;;  %v946_v43 = vmul.f32 %v3281_v54, %v3335_v32  ;;  %v3379_v47 = vld [vmem:[#allocation2 + $0x18] sm:$0xff]  ;;  %v1044_v48 = vmul.f32 %v3285_v56, %v3335_v32  ;;  %v1093_v50 = vmul.f32 %v3299_v63, %v3335_v32 }
 0x176   : > { %1054 = vrot.lane.b32.xlu0 %v1042_v30, %s3084_s0  ;;  %958 = vrot.lane.b32.xlu1 %v945_v31, %s3083_s30  ;;  %v947_v49 = vmul.f32 %v3295_v61, %v3379_v47  ;;  %v996_v51 = vmul.f32 %v3287_v57, %v3379_v47  ;;  %v1142_v52 = vmul.f32 %v3291_v59, %v3335_v32  ;;  %v1343_v31 = vld [vmem:[%s4076_s27 + $0x80] sm:$0xff] }
 0x177   : > { %v1045_v53 = vmul.f32 %v3289_v58, %v3379_v47  ;;  %v1191_v54 = vmul.f32 %v3293_v60, %v3335_v32  ;;  %v1094_v55 = vmul.f32 %v3303_v1, %v3379_v47  ;;  %v1239_v56 = vmul.f32 %v3297_v62, %v3335_v32 }
 0x178   : > { %v1143_v59 = vmul.f32 %v3305_v2, %v3379_v47  ;;  %v1288_v60 = vmul.f32 %v3309_v6, %v3335_v32  ;;  %v1192_v63 = vmul.f32 %v3301_v0, %v3379_v47  ;;  %v3417_v11 = vld [vmem:[#allocation2 + $0x28] sm:$0xff]  ;;  %v1240_v13 = vmul.f32 %v3307_v3, %v3379_v47 }
 0x179   : > { %v949_v62 = vmul.f32 %v3295_v61, %v3417_v11  ;;  %v998_v6 = vmul.f32 %v3287_v57, %v3417_v11  ;;  %v1047_v20 = vmul.f32 %v3289_v58, %v3417_v11  ;;  %v1096_v23 = vmul.f32 %v3303_v1, %v3417_v11 }
 0x17a   : > { %1103 = vrot.lane.b32.xlu0 %v1091_v33, %s3085_s21  ;;  %1009 = vrot.lane.b32.xlu1 %v995_v34, %s4066_s29  ;;  %v1046_v61 = vmul.f32 %v3289_v58, %v3322_v26  ;;  %v1145_v24 = vmul.f32 %v3305_v2, %v3417_v11  ;;  %v1095_v57 = vmul.f32 %v3303_v1, %v3322_v26  ;;  %v1327_v33 = vld [vmem:[%s4076_s27] sm:$0xff] }
 0x17b   : > { %v1194_v27 = vmul.f32 %v3301_v0, %v3417_v11  ;;  %v1144_v58 = vmul.f32 %v3305_v2, %v3322_v26  ;;  %v1242_v28 = vmul.f32 %v3307_v3, %v3417_v11  ;;  %v1193_v1 = vmul.f32 %v3301_v0, %v3322_v26 }
 0x17c   : > { %v1241_v2 = vmul.f32 %v3307_v3, %v3322_v26  ;;  %v1289_v30 = vmul.f32 %v3311_v7, %v3379_v47  ;;  %v1291_v0 = vmul.f32 %v3311_v7, %v3417_v11  ;;  %v1344_v3 = vld [vmem:[%s4076_s27 + $0x88] sm:$0xff] }
 0x17d   : > { %v2868_v34 = vpack.c.bf16 %v1344_v3, %v1343_v31  ;;  %v1328_v7 = vld [vmem:[%s4076_s27 + $0x8] sm:$0xff] }
 0x17e   : > { %1152 = vrot.lane.b32.xlu0 %v1140_v35, %s4064_s23  ;;  %1056 = vrot.lane.b32.xlu1 %v1043_v36, %s3084_s0  ;;  %v1345_v35 = vld [vmem:[%s4076_s27 + $0x90] sm:$0xff]  ;;  %v1346_v36 = vld [vmem:[%s4076_s27 + $0x98] sm:$0xff] }
 0x17f   : > { %2869 = vmatprep.subr.bf16.mxu0 %v2868_v34 }
 0x182   : > { %1201 = vrot.lane.b32.xlu0 %v1189_v37, %s3087_s24  ;;  %1105 = vrot.lane.b32.xlu1 %v1092_v38, %s3085_s21  ;;  %v2870_v37 = vpack.c.bf16 %v1328_v7, %v1327_v33  ;;  %v2872_v38 = vpack.c.bf16 %v1346_v36, %v1345_v35 }
 0x184   : > { %2871 = vmatpush3.bf16.msra.mxu0 %v2870_v37 }
 0x185   : > { %2873 = vmatprep.subr.bf16.mxu0 %v2872_v38 }
 0x186   : > { %1249 = vrot.lane.b32.xlu0 %v1237_v39, %s3088_s2  ;;  %1154 = vrot.lane.b32.xlu1 %v1141_v40, %s4064_s23  ;;  %v1329_v39 = vld [vmem:[%s4076_s27 + $0x10] sm:$0xff]  ;;  %v1330_v40 = vld [vmem:[%s4076_s27 + $0x18] sm:$0xff] }
 0x18a   : > { %1298 = vrot.lane.b32.xlu0 %v1286_v41, %s3089_s25  ;;  %1203 = vrot.lane.b32.xlu1 %v1190_v42, %s3087_s24  ;;  %v1347_v41 = vld [vmem:[%s4076_s27 + $0xa0] sm:$0xff]  ;;  %v1348_v42 = vld [vmem:[%s4076_s27 + $0xa8] sm:$0xff] }
 0x18e   : > { %960 = vrot.lane.b32.xlu0 %v946_v43, %s3083_s30  ;;  %1251 = vrot.lane.b32.xlu1 %v1238_v44, %s3088_s2  ;;  %v2874_v43 = vpack.c.bf16 %v1330_v40, %v1329_v39  ;;  %v2876_v44 = vpack.c.bf16 %v1348_v42, %v1347_v41  ;;  %v924_v39 = vmul.f32 %v3313_v8, %v3320_v25 }
 0x190   : > { %2875 = vmatpush3.bf16.msra.mxu0 %v2874_v43 }
 0x191   : > { %2877 = vmatprep.subr.bf16.mxu0 %v2876_v44 }
 0x192   : > { %1007 = vrot.lane.b32.xlu0 %v994_v45, %s4066_s29  ;;  %1300 = vrot.lane.b32.xlu1 %v1287_v46, %s3089_s25  ;;  %v1331_v45 = vld [vmem:[%s4076_s27 + $0x20] sm:$0xff]  ;;  %v1332_v46 = vld [vmem:[%s4076_s27 + $0x28] sm:$0xff] }
 0x196   : > { %1058 = vrot.lane.b32.xlu0 %v1044_v48, %s3084_s0  ;;  %962 = vrot.lane.b32.xlu1 %v947_v49, %s3083_s30  ;;  %v1349_v48 = vld [vmem:[%s4076_s27 + $0xb0] sm:$0xff]  ;;  %v1350_v49 = vld [vmem:[%s4076_s27 + $0xb8] sm:$0xff] }
 0x19a   : > { %1107 = vrot.lane.b32.xlu0 %v1093_v50, %s3085_s21  ;;  %1011 = vrot.lane.b32.xlu1 %v996_v51, %s4066_s29  ;;  %v2878_v50 = vpack.c.bf16 %v1332_v46, %v1331_v45  ;;  %v2880_v51 = vpack.c.bf16 %v1350_v49, %v1349_v48 }
 0x19c   : > { %2879 = vmatpush3.bf16.msra.mxu0 %v2878_v50  ;;  %v926_v50 = vmul.f32 %v3313_v8, %v3335_v32 }
 0x19d   : > { %2881 = vmatprep.subr.bf16.mxu0 %v2880_v51 }
 0x19e   : > { %1156 = vrot.lane.b32.xlu0 %v1142_v52, %s4064_s23  ;;  %1060 = vrot.lane.b32.xlu1 %v1045_v53, %s3084_s0  ;;  %v1333_v52 = vld [vmem:[%s4076_s27 + $0x30] sm:$0xff]  ;;  %v1334_v53 = vld [vmem:[%s4076_s27 + $0x38] sm:$0xff] }
 0x1a2   : > { %1205 = vrot.lane.b32.xlu0 %v1191_v54, %s3087_s24  ;;  %1109 = vrot.lane.b32.xlu1 %v1094_v55, %s3085_s21  ;;  %v1351_v54 = vld [vmem:[%s4076_s27 + $0xc0] sm:$0xff]  ;;  %v1352_v55 = vld [vmem:[%s4076_s27 + $0xc8] sm:$0xff] }
 0x1a6   : > { %1253 = vrot.lane.b32.xlu0 %v1239_v56, %s3088_s2  ;;  %1158 = vrot.lane.b32.xlu1 %v1143_v59, %s4064_s23  ;;  %v2882_v56 = vpack.c.bf16 %v1334_v53, %v1333_v52  ;;  %v2884_v59 = vpack.c.bf16 %v1352_v55, %v1351_v54  ;;  %v925_v55 = vmul.f32 %v3313_v8, %v3317_v21  ;;  %v1340_v8 = vld [vmem:[%s4076_s27 + $0x68] sm:$0xff] }
 0x1a8   : > { %2883 = vmatpush3.bf16.msra.mxu0 %v2882_v56 }
 0x1a9   : > { %2885 = vmatprep.subr.bf16.mxu0 %v2884_v59 }
 0x1aa   : > { %1302 = vrot.lane.b32.xlu0 %v1288_v60, %s3089_s25  ;;  %1207 = vrot.lane.b32.xlu1 %v1192_v63, %s3087_s24  ;;  %v1335_v60 = vld [vmem:[%s4076_s27 + $0x40] sm:$0xff]  ;;  %v1336_v63 = vld [vmem:[%s4076_s27 + $0x48] sm:$0xff] }
 0x1ae   : > { %966 = vrot.lane.b32.xlu0 %v949_v62, %s3083_s30  ;;  %1255 = vrot.lane.b32.xlu1 %v1240_v13, %s3088_s2 }
 0x1b2   : > { %1015 = vrot.lane.b32.xlu0 %v998_v6, %s4066_s29  ;;  %964 = vrot.lane.b32.xlu1 %v948_v19, %s3083_s30  ;;  %v1353_v6 = vld [vmem:[%s4076_s27 + $0xd0] sm:$0xff]  ;;  %v1354_v19 = vld [vmem:[%s4076_s27 + $0xd8] sm:$0xff] }
 0x1b6   : > { %1064 = vrot.lane.b32.xlu0 %v1047_v20, %s3084_s0  ;;  %1013 = vrot.lane.b32.xlu1 %v997_v22, %s4066_s29  ;;  %v2886_v20 = vpack.c.bf16 %v1336_v63, %v1335_v60  ;;  %v2888_v22 = vpack.c.bf16 %v1354_v19, %v1353_v6  ;;  %v1339_v19 = vld [vmem:[%s4076_s27 + $0x60] sm:$0xff]  ;;  %s2632_s29 = sshll.u32 %s4082_s22, 3 }
 0x1b8   : > { %2887 = vmatpush3.bf16.msra.mxu0 %v2886_v20 }
 0x1b9   : > { %2889 = vmatprep.subr.bf16.mxu0 %v2888_v22  ;;  %v2894_v22 = vpack.c.bf16 %v1340_v8, %v1339_v19 }
 0x1ba   : > { %1113 = vrot.lane.b32.xlu0 %v1096_v23, %s3085_s21  ;;  %1062 = vrot.lane.b32.xlu1 %v1046_v61, %s3084_s0  ;;  %v1337_v23 = vld [vmem:[%s4076_s27 + $0x50] sm:$0xff]  ;;  %v1338_v61 = vld [vmem:[%s4076_s27 + $0x58] sm:$0xff]  ;;  %s4079_s0 = smov 108  }
 0x1be   : > { %1162 = vrot.lane.b32.xlu0 %v1145_v24, %s4064_s23  ;;  %1111 = vrot.lane.b32.xlu1 %v1095_v57, %s3085_s21  ;;  %s3097_s21 = smov 107  }
 0x1c2   : > { %1211 = vrot.lane.b32.xlu0 %v1194_v27, %s3087_s24  ;;  %1160 = vrot.lane.b32.xlu1 %v1144_v58, %s4064_s23  ;;  %v1355_v27 = vld [vmem:[%s4076_s27 + $0xe0] sm:$0xff]  ;;  %v1356_v58 = vld [vmem:[%s4076_s27 + $0xe8] sm:$0xff] }
 0x1c6   : > { %1259 = vrot.lane.b32.xlu0 %v1242_v28, %s3088_s2  ;;  %1209 = vrot.lane.b32.xlu1 %v1193_v1, %s3087_s24  ;;  %v2890_v28 = vpack.c.bf16 %v1338_v61, %v1337_v23  ;;  %v2892_v1 = vpack.c.bf16 %v1356_v58, %v1355_v27  ;;  %s3098_s24 = smov 106  }
 0x1c8   : > { %2891 = vmatpush3.bf16.msra.mxu0 %v2890_v28 }
 0x1c9   : > { %2893 = vmatprep.subr.bf16.mxu0 %v2892_v1 }
 0x1ca   : > { %1306 = vrot.lane.b32.xlu0 %v1290_v29, %s3089_s25  ;;  %1257 = vrot.lane.b32.xlu1 %v1241_v2, %s3088_s2 }
 0x1cc   : > { %2895 = vmatpush3.bf16.msra.mxu0 %v2894_v22 }
 0x1ce   : > { %1304 = vrot.lane.b32.xlu0 %v1289_v30, %s3089_s25  ;;  %1308 = vrot.lane.b32.xlu1 %v1291_v0, %s3089_s25  ;;  %s3090_s25 = smov 123  }
 0x1e4   : > { %v1006_v62 = vpop.permute.xlu0 %1005  ;;  %v957_v13 = vpop.permute.xlu1 %956 }
 0x1e8   : > { %v1055_v24 = vpop.permute.xlu0 %1054  ;;  %v959_v57 = vpop.permute.xlu1 %958 }
 0x1e9   : > { %v969_v38 = vsel %vm968_vm6, %v957_v13, %v959_v57 }
 0x1ea   : > { %v979_v40 = vadd.f32 %v969_v38, %v924_v39 }
 0x1ec   : > { %v1104_v29 = vpop.permute.xlu0 %1103  ;;  %v1010_v2 = vpop.permute.xlu1 %1009 }
 0x1f0   : > { %v1153_v30 = vpop.permute.xlu0 %1152  ;;  %v1057_v0 = vpop.permute.xlu1 %1056 }
 0x1f1   : > { %v1067_v48 = vsel %vm1066_vm8, %v1055_v24, %v1057_v0 }
 0x1f4   : > { %v1202_v31 = vpop.permute.xlu0 %1201  ;;  %v1106_v3 = vpop.permute.xlu1 %1105 }
 0x1f5   : > { %v1116_v52 = vsel %vm1115_vm9, %v1104_v29, %v1106_v3  ;;  %v1357_v29 = vld [vmem:[%s4076_s27 + $0xf0] sm:$0xff] }
 0x1f8   : > { %v3553_v33 = vpop.permute.xlu0 %1249  ;;  %v1155_v34 = vpop.permute.xlu1 %1154 }
 0x1f9   : > { %v1165_v32 = vsel %vm1164_vm10, %v1153_v30, %v1155_v34  ;;  %v1341_v30 = vld [vmem:[%s4076_s27 + $0x70] sm:$0xff] }
 0x1fc   : > { %v3555_v7 = vpop.permute.xlu0 %1298  ;;  %v1204_v35 = vpop.permute.xlu1 %1203 }
 0x1fd   : > { %v1213_v58 = vsel %vm901_vm5, %v1202_v31, %v1204_v35  ;;  %v1342_v31 = vld [vmem:[%s4076_s27 + $0x78] sm:$0xff] }
 0x1fe   : > { %v2898_v39 = vpack.c.bf16 %v1342_v31, %v1341_v30 }
 0x200   : > { %v961_v36 = vpop.permute.xlu0 %960  ;;  %v3557_v37 = vpop.permute.xlu1 %1251 }
 0x201   : > { %v970_v53 = vsel %vm968_vm6, %v959_v57, %v961_v36  ;;  %v981_v54 = vadd.f32 %v961_v36, %v926_v50  ;;  %v1361_v50 = vld [vmem:[%s4076_s27 + $0x110] sm:$0xff] }
 0x202   : > { %v980_v60 = vadd.f32 %v970_v53, %v925_v55  ;;  %v1363_v55 = vld [vmem:[%s4076_s27 + $0x120] sm:$0xff] }
 0x203   : > { %v1030_v13 = vadd.f32 %v1010_v2, %v981_v54 }
 0x204   : > { %v1008_v41 = vpop.permute.xlu0 %1007  ;;  %v3562_v42 = vpop.permute.xlu1 %1300 }
 0x205   : > { %v1018_v43 = vsel %vm1017_vm7, %v1006_v62, %v1008_v41  ;;  %v1019_v59 = vsel %vm1017_vm7, %v1008_v41, %v1010_v2  ;;  %v1358_v2 = vld [vmem:[%s4076_s27 + $0xf8] sm:$0xff] }
 0x206   : > { %v1028_v44 = vadd.f32 %v1018_v43, %v979_v40  ;;  %v1029_v21 = vadd.f32 %v1019_v59, %v980_v60  ;;  %v2896_v36 = vpack.c.bf16 %v1358_v2, %v1357_v29 }
 0x208   : > { %v1059_v45 = vpop.permute.xlu0 %1058  ;;  %v3565_v46 = vpop.permute.xlu1 %962  ;;  %v1077_v49 = vadd.f32 %v1067_v48, %v1028_v44  ;;  %2897 = vmatprep.subr.bf16.mxu0 %v2896_v36  ;;  %v1262_v44 = vsel %vm1261_vm11, %v3553_v33, %v3557_v37 }
 0x209   : > { %v1068_v6 = vsel %vm1066_vm8, %v1057_v0, %v1059_v45  ;;  %v1079_v23 = vadd.f32 %v1059_v45, %v1030_v13  ;;  %2899 = vmatpush3.bf16.msra.mxu0 %v2898_v39 }
 0x20a   : > { %v1126_v56 = vadd.f32 %v1116_v52, %v1077_v49  ;;  %v1078_v24 = vadd.f32 %v1068_v6, %v1029_v21  ;;  %v1359_v49 = vld [vmem:[%s4076_s27 + $0x100] sm:$0xff] }
 0x20c   : > { %v1108_v25 = vpop.permute.xlu0 %1107  ;;  %v3570_v51 = vpop.permute.xlu1 %1011  ;;  %v1175_v20 = vadd.f32 %v1165_v32, %v1126_v56  ;;  %v1364_v56 = vld [vmem:[%s4076_s27 + $0x128] sm:$0xff]  ;;  %v1311_v32 = vsel %vm1310_vm12, %v3555_v7, %v3562_v42  ;;  %v1366_v7 = vld [vmem:[%s4076_s27 + $0x138] sm:$0xff] }
 0x20d   : > { %v1117_v61 = vsel %vm1115_vm9, %v1106_v3, %v1108_v25  ;;  %v1128_v28 = vadd.f32 %v1108_v25, %v1079_v23  ;;  %v2908_v21 = vpack.c.bf16 %v1364_v56, %v1363_v55 }
 0x20e   : > { %v1223_v0 = vadd.f32 %v1213_v58, %v1175_v20  ;;  %v1127_v3 = vadd.f32 %v1117_v61, %v1078_v24  ;;  %v1365_v20 = vld [vmem:[%s4076_s27 + $0x130] sm:$0xff]  ;;  %v1367_v58 = vld [vmem:[%s4076_s27 + $0x140] sm:$0xf] }
 0x20f   : > { %v2912_v61 = vpack.c.bf16 %v1366_v7, %v1365_v20 }
 0x210   : > { %v1157_v63 = vpop.permute.xlu0 %1156  ;;  %v3577_v62 = vpop.permute.xlu1 %1060  ;;  %v1272_v25 = vadd.f32 %v1262_v44, %v1223_v0 }
 0x211   : > { %v1166_v1 = vsel %vm1164_vm10, %v1155_v34, %v1157_v63  ;;  %v1177_v34 = vadd.f32 %v1157_v63, %v1128_v28 }
 0x212   : > { %v1176_v40 = vadd.f32 %v1166_v1, %v1127_v3  ;;  %v1321_v19 = vadd.f32 %v1311_v32, %v1272_v25  ;;  %v929_v3 = vmul.f32 %v3315_v9, %v3417_v11 }
 0x214   : > { %v1206_v57 = vpop.permute.xlu0 %1205  ;;  %v3588_v27 = vpop.permute.xlu1 %1109 }
 0x215   : > { %v1214_v38 = vsel %vm901_vm5, %v1204_v35, %v1206_v57  ;;  %v1225_v45 = vadd.f32 %v1206_v57, %v1177_v34  ;;  %v1360_v35 = vld [vmem:[%s4076_s27 + $0x108] sm:$0xff]  ;;  %v927_v34 = vmul.f32 %v3315_v9, %v3379_v47 }
 0x216   : > { %v1224_v33 = vadd.f32 %v1214_v38, %v1176_v40  ;;  %v2900_v52 = vpack.c.bf16 %v1360_v35, %v1359_v49  ;;  %v928_v38 = vmul.f32 %v3315_v9, %v3322_v26 }
 0x218   : > { %v1254_v41 = vpop.permute.xlu0 %1253  ;;  %v3605_v43 = vpop.permute.xlu1 %1158  ;;  %2901 = vmatprep.subr.bf16.mxu1 %v2900_v52 }
 0x219   : > { %v1263_v48 = vsel %vm1261_vm11, %v3557_v37, %v1254_v41  ;;  %v1362_v37 = vld [vmem:[%s4076_s27 + $0x118] sm:$0xff]  ;;  %v1274_v53 = vadd.f32 %v1254_v41, %v1225_v45  ;;  %2903 = vmatpush3.bf16.msra.mxu1 %v2900_v52 }
 0x21a   : > { %v2904_v54 = vpack.c.bf16 %v1362_v37, %v1361_v50  ;;  %v1273_v59 = vadd.f32 %v1263_v48, %v1224_v33 }
 0x21c   : > { %v1303_v60 = vpop.permute.xlu0 %1302  ;;  %v3630_v63 = vpop.permute.xlu1 %1207  ;;  %2905 = vmatprep.subr.bf16.mxu1 %v2904_v54 }
 0x21d   : > { %v1312_v13 = vsel %vm1310_vm12, %v3562_v42, %v1303_v60  ;;  %v1323_v6 = vadd.f32 %v1303_v60, %v1274_v53  ;;  %2907 = vmatpush3.bf16.msra.mxu1 %v2904_v54 }
 0x21e   : > { %v1322_v8 = vadd.f32 %v1312_v13, %v1273_v59  ;;  %2909 = vmatprep.subr.bf16.mxu1 %v2908_v21 }
 0x21f   : > { %1390 = vrot.lane.b32.xlu0 %v1323_v6, %s3090_s25 }
 0x220   : > { %v967_v22 = vpop.permute.xlu0 %966  ;;  %v1256_v23 = vpop.permute.xlu1 %1255  ;;  %v3016_v42 = vpack.i.bf16 %v1321_v19, %v1322_v8 }
 0x221   : > { %2911 = vmatpush3.bf16.msra.mxu1 %v2908_v21  ;;  %v984_v39 = vadd.f32 %v967_v22, %v929_v3  ;;  %v1568_v3 = vld [vmem:[%s4051_s10] sm:$0xff] }
 0x222   : > { %3017 = vrot.lane.b32.xlu1 %v3016_v42, %s3090_s25  ;;  %2913 = vmatprep.subr.bf16.mxu1 %v2912_v61 }
 0x224   : > { %v1016_v24 = vpop.permute.xlu0 %1015  ;;  %v965_v57 = vpop.permute.xlu1 %964 }
 0x225   : > { %2915 = vmatpush3.bf16.msra.mxu1 %v2912_v61  ;;  %v971_v36 = vsel %vm968_vm6, %v3565_v46, %v965_v57  ;;  %v972_v31 = vsel %vm968_vm6, %v965_v57, %v967_v22  ;;  %v1033_v49 = vadd.f32 %v1016_v24, %v984_v39 }
 0x226   : > { %2774 = vmatprep.subr.msk.mxu1 %vm682_vm1, %v1367_v58  ;;  %v982_v44 = vadd.f32 %v971_v36, %v927_v34  ;;  %v983_v45 = vadd.f32 %v972_v31, %v928_v38  ;;  %v1654_v36 = vld [vmem:[%s4053_s12 + $0x10] sm:$0xff]  ;;  %v1653_v31 = vld [vmem:[%s4053_s12 + $0x8] sm:$0xff]  ;;  %v1655_v34 = vld [vmem:[%s4053_s12 + $0x18] sm:$0xff] }
 0x228   : > { %v1065_v28 = vpop.permute.xlu0 %1064  ;;  %v1014_v1 = vpop.permute.xlu1 %1013 }
 0x229   : > { %2775 = vmatpush3.msk.msra.mxu1 %vm682_vm1, %v1367_v58  ;;  %v1020_v40 = vsel %vm1017_vm7, %v3570_v51, %v1014_v1  ;;  %v1021_v41 = vsel %vm1017_vm7, %v1014_v1, %v1016_v24  ;;  %v1082_v25 = vadd.f32 %v1065_v28, %v1033_v49 }
 0x22a   : > { %v1031_v47 = vadd.f32 %v1020_v40, %v982_v44  ;;  %v1032_v50 = vadd.f32 %v1021_v41, %v983_v45 }
 0x22c   : > { %v1114_v29 = vpop.permute.xlu0 %1113  ;;  %v1063_v2 = vpop.permute.xlu1 %1062 }
 0x22d   : > { %v1069_v46 = vsel %vm1066_vm8, %v3577_v62, %v1063_v2  ;;  %v1070_v35 = vsel %vm1066_vm8, %v1063_v2, %v1065_v28  ;;  %v1131_v53 = vadd.f32 %v1114_v29, %v1082_v25  ;;  %v3705_v25 = vld [vmem:[#allocation3] sm:$0xff] }
 0x22e   : > { %v1080_v51 = vadd.f32 %v1069_v46, %v1031_v47  ;;  %v1081_v33 = vadd.f32 %v1070_v35, %v1032_v50  ;;  %v3091_v50 = vmov 0.0|0.0  }
 0x22f   : > { %2916 = vmatprep.subr.bf16.mxu1 %v3091_v50  ;;  %2925 = vmatprep.subr.bf16.mxu0 %v3091_v50 }
 0x230   : > { %v1163_v30 = vpop.permute.xlu0 %1162  ;;  %v1112_v0 = vpop.permute.xlu1 %1111 }
 0x231   : > { %v1118_v9 = vsel %vm1115_vm9, %v3588_v27, %v1112_v0  ;;  %v1119_v26 = vsel %vm1115_vm9, %v1112_v0, %v1114_v29  ;;  %v1180_v59 = vadd.f32 %v1163_v30, %v1131_v53  ;;  %v1652_v0 = vld [vmem:[%s4053_s12] sm:$0xff] }
 0x232   : > { %v1129_v55 = vadd.f32 %v1118_v9, %v1080_v51  ;;  %v1130_v56 = vadd.f32 %v1119_v26, %v1081_v33 }
 0x234   : > { %v1212_v11 = vpop.permute.xlu0 %1211  ;;  %v1161_v48 = vpop.permute.xlu1 %1160 }
 0x235   : > { %v1167_v54 = vsel %vm1164_vm10, %v3605_v43, %v1161_v48  ;;  %v1168_v62 = vsel %vm1164_vm10, %v1161_v48, %v1163_v30  ;;  %v1228_v8 = vadd.f32 %v1212_v11, %v1180_v59  ;;  %v1368_v30 = vld [vmem:[%s4049_s8] sm:$0xff] }
 0x236   : > { %v1178_v32 = vadd.f32 %v1167_v54, %v1129_v55  ;;  %v1179_v13 = vadd.f32 %v1168_v62, %v1130_v56 }
 0x238   : > { %v1260_v52 = vpop.permute.xlu0 %1259  ;;  %v1210_v37 = vpop.permute.xlu1 %1209 }
 0x239   : > { %v1215_v60 = vsel %vm901_vm5, %v3630_v63, %v1210_v37  ;;  %v1216_v27 = vsel %vm901_vm5, %v1210_v37, %v1212_v11  ;;  %v1277_v22 = vadd.f32 %v1260_v52, %v1228_v8  ;;  %v1648_v8 = vld [vmem:[%s4052_s11] sm:$0xff]  ;;  %vm2309_vm5 = vcmask 818176  }
 0x23a   : > { %v1226_v43 = vadd.f32 %v1215_v60, %v1178_v32  ;;  %v1227_v7 = vadd.f32 %v1216_v27, %v1179_v13 }
 0x23c   : > { %v1307_v6 = vpop.permute.xlu0 %1306  ;;  %v1258_v19 = vpop.permute.xlu1 %1257 }
 0x23d   : > { %v1264_v21 = vsel %vm1261_vm11, %v1256_v23, %v1258_v19  ;;  %v1265_v20 = vsel %vm1261_vm11, %v1258_v19, %v1260_v52  ;;  %v1369_v23 = vld [vmem:[%s4049_s8 + $0x8] sm:$0xff]  ;;  %v1567_v19 = vld [vmem:[%s4050_s9] sm:$0xff] }
 0x23e   : > { %v1275_v42 = vadd.f32 %v1264_v21, %v1226_v43  ;;  %v1276_v61 = vadd.f32 %v1265_v20, %v1227_v7  ;;  %v3721_v21 = vld [vmem:[%s4054_s13 + $0x8] sm:$0xff]  ;;  %v3728_v20 = vld [vmem:[%s4054_s13] sm:$0xff]  ;;  %v3737_v43 = vld [vmem:[%s4054_s13 + $0x18] sm:$0xff] }
 0x23f   : > { %v3742_v7 = vld [vmem:[%s4054_s13 + $0x10] sm:$0xff] }
 0x240   : > { %v1305_v24 = vpop.permute.xlu0 %1304  ;;  %v1309_v57 = vpop.permute.xlu1 %1308 }
 0x241   : > { %v1313_v63 = vsel %vm1310_vm12, %v1305_v24, %v1307_v6  ;;  %v1314_v58 = vsel %vm1310_vm12, %v1307_v6, %v1309_v57  ;;  %v1326_v28 = vadd.f32 %v1309_v57, %v1277_v22 }
 0x242   : > { %v1324_v1 = vadd.f32 %v1313_v63, %v1275_v42  ;;  %v1325_v29 = vadd.f32 %v1314_v58, %v1276_v61  ;;  %v2649_v63 = vld [vmem:[%s4077_s3] ss:$0 sm:$0xff]  ;;  %s4078_s3 = smov 126  }
 0x243   : > { %1396 = vrot.lane.b32.xlu0 %v1326_v28, %s3090_s25 }
 0x244   : > { %v3021_v2 = vpack.i.bf16 %v1324_v1, %v1325_v29 }
 0x246   : > { %3022 = vrot.lane.b32.xlu1 %v3021_v2, %s3090_s25 }
 0x247   : > { %1377 = vperm.xlu0 %3014, %v1369_v23  }
 0x24a   : > { %1372 = vperm.xlu1 %3015, %v1368_v30  }
 0x24b   : > { %1658 = vperm.xlu0 %3014, %v1652_v0  }
 0x24e   : > { %1571 = vperm.xlu1 %3015, %v1568_v3  }
 0x24f   : > { %1668 = vperm.xlu0 %3014, %v1654_v36  }
 0x252   : > { %1663 = vperm.xlu1 %3015, %v1653_v31  }
 0x253   : > { %3028 = vset.pattern.permute.xlu0 %v3074_v10 }
 0x254   : > { %1890 = vperm.xlu0 %3028, %v3721_v21  }
 0x256   : > { %1673 = vperm.xlu1 %3015, %v1655_v34  }
 0x258   : > { %3029 = vset.pattern.permute.xlu0 %v3073_v5 }
 0x259   : > { %1846 = vperm.xlu0 %3029, %v3728_v20  }
 0x25a   : > { %3026 = vset.pattern.permute.xlu1 %v3073_v5 }
 0x25b   : > { %1850 = vperm.xlu1 %3026, %v3721_v21  }
 0x25d   : > { %1854 = vperm.xlu0 %3029, %v3742_v7  }
 0x25f   : > { %3027 = vset.pattern.permute.xlu1 %v3074_v10 }
 0x260   : > { %1886 = vperm.xlu1 %3027, %v3728_v20  }
 0x261   : > { %3032 = vset.pattern.permute.xlu0 %v3075_v12 }
 0x262   : > { %1930 = vperm.xlu0 %3032, %v3721_v21  }
 0x264   : > { %3030 = vset.pattern.permute.xlu1 %v3073_v5 }
 0x265   : > { %1858 = vperm.xlu1 %3030, %v3737_v43  }
 0x266   : > { %1938 = vperm.xlu0 %3032, %v3737_v43  }
 0x269   : > { %3031 = vset.pattern.permute.xlu1 %v3075_v12 }
 0x26a   : > { %1926 = vperm.xlu1 %3031, %v3728_v20   ;;  %3036 = vset.pattern.permute.xlu0 %v3076_v14 }
 0x26b   : > { %1966 = vperm.xlu0 %3036, %v3728_v20  }
 0x26e   : > { %3033 = vset.pattern.permute.xlu1 %v3074_v10 }
 0x26f   : > { %1894 = vperm.xlu1 %3033, %v3742_v7   ;;  %1974 = vperm.xlu0 %3036, %v3742_v7  }
 0x273   : > { %1898 = vperm.xlu1 %3033, %v3737_v43   ;;  %3040 = vset.pattern.permute.xlu0 %v3078_v16 }
 0x274   : > { %2050 = vperm.xlu0 %3040, %v3721_v21  }
 0x277   : > { %3034 = vset.pattern.permute.xlu1 %v3076_v14 }
 0x278   : > { %1970 = vperm.xlu1 %3034, %v3721_v21   ;;  %2058 = vperm.xlu0 %3040, %v3737_v43  }
 0x27c   : > { %3035 = vset.pattern.permute.xlu1 %v3075_v12  ;;  %3044 = vset.pattern.permute.xlu0 %v3080_v18 }
 0x27d   : > { %1934 = vperm.xlu1 %3035, %v3742_v7   ;;  %2086 = vperm.xlu0 %3044, %v3728_v20  }
 0x281   : > { %3037 = vset.pattern.permute.xlu1 %v3077_v15 }
 0x282   : > { %2006 = vperm.xlu1 %3037, %v3728_v20  }
 0x286   : > { %2010 = vperm.xlu1 %3037, %v3721_v21  }
 0x28a   : > { %3038 = vset.pattern.permute.xlu1 %v3076_v14 }
 0x28b   : > { %1978 = vperm.xlu1 %3038, %v3737_v43  }
 0x28f   : > { %3039 = vset.pattern.permute.xlu1 %v3078_v16 }
 0x290   : > { %2046 = vperm.xlu1 %3039, %v3728_v20  }
 0x291   : > { %v1391_v38 = vpop.permute.xlu0 %1390 }
 0x292   : > { %2776 = vmatprep.mubr.msk.f32.mxu1 %vm1407_vm13, %v1391_v38 }
 0x294   : > { %v3018_v39 = vpop.permute.xlu1 %3017  ;;  %3041 = vset.pattern.permute.xlu1 %v3077_v15  ;;  %v1649_v15 = vld [vmem:[%s4052_s11 + $0x8] sm:$0xff] }
 0x295   : > { %v3020_v40 = vunpack.i.h.bf16 %v3018_v39  ;;  %v3019_v41 = vunpack.i.l.bf16 %v3018_v39  ;;  %2014 = vperm.xlu1 %3041, %v3742_v7  }
 0x297   : > { %v1400_v44 = vsel %vm1398_vm14, %v3019_v41, %v1391_v38  ;;  %v1399_v45 = vsel %vm1398_vm14, %v3020_v40, %v3019_v41 }
 0x298   : > { %1479 = vmatprep.mubr.f32.mxu0 %v1400_v44  ;;  %v2166_v44 = vld [vmem:[%s4055_s14 + $0x8] sm:$0xff] }
 0x299   : > { %1480 = vmatmul.mubr.f32.vlgmr.msra.gmra.mrb[4].mxu0 %v1399_v45  ;;  %2018 = vperm.xlu1 %3041, %v3737_v43   ;;  %v2168_v45 = vld [vmem:[%s4055_s14 + $0x18] sm:$0xff] }
 0x29d   : > { %3042 = vset.pattern.permute.xlu1 %v3080_v18 }
 0x29e   : > { %2090 = vperm.xlu1 %3042, %v3721_v21  }
 0x2a2   : > { %3043 = vset.pattern.permute.xlu1 %v3078_v16  ;;  %v1650_v16 = vld [vmem:[%s4052_s11 + $0x10] sm:$0xff] }
 0x2a3   : > { %2054 = vperm.xlu1 %3043, %v3742_v7  }
 0x2a7   : > { %3045 = vset.pattern.permute.xlu1 %v3079_v17 }
 0x2a8   : > { %2126 = vperm.xlu1 %3045, %v3728_v20  }
 0x2ac   : > { %2130 = vperm.xlu1 %3045, %v3721_v21  }
 0x2b0   : > { %3046 = vset.pattern.permute.xlu1 %v3080_v18  ;;  %v1651_v18 = vld [vmem:[%s4052_s11 + $0x18] sm:$0xff] }
 0x2b5   : > { %v1397_v11 = vpop.permute.xlu0 %1396 }
 0x2b6   : > { %2777 = vmatmul.mubr.msk.f32.vlgmr.msra.gmra.mrb[2].mxu1 %vm1407_vm13, %v1397_v11 }
 0x2b7   : > { %2783 = vmatprep.mubr.msk.f32.mxu1 %vm3092_vm15, %v3705_v25 }
 0x2b8   : > { %v3023_v48 = vpop.permute.xlu1 %3022 }
 0x2b9   : > { %v3025_v49 = vunpack.i.h.bf16 %v3023_v48  ;;  %v3024_v46 = vunpack.i.l.bf16 %v3023_v48 }
 0x2bb   : > { %v1402_v35 = vsel %vm1398_vm14, %v3024_v46, %v1397_v11  ;;  %v1401_v47 = vsel %vm1398_vm14, %v3025_v49, %v3024_v46  ;;  %v2165_v11 = vld [vmem:[%s4055_s14] sm:$0xff]  ;;  %v2167_v49 = vld [vmem:[%s4055_s14 + $0x10] sm:$0xff] }
 0x2bc   : > { %1484 = vmatprep.mubr.f32.mxu0 %v1402_v35 }
 0x2bd   : > { %1485 = vmatmul.mubr.f32.gmra.mrb[6].mxu0 %v1401_v47 }
 0x2be   : > { %2831 = vmatprep.mubr.msk.f32.mxu0 %vm3092_vm15, %v3705_v25 }
 0x2c6   : > { %v1378_v59 = vpop.permute.xlu0 %1377 }
 0x2c9   : > { %v1373_v33 = vpop.permute.xlu1 %1372 }
 0x2ca   : > { %v1659_v61 = vpop.permute.xlu0 %1658 }
 0x2cd   : > { %v1572_v5 = vpop.permute.xlu1 %1571 }
 0x2ce   : > { %v1669_v36 = vpop.permute.xlu0 %1668 }
 0x2d1   : > { %v1664_v22 = vpop.permute.xlu1 %1663 }
 0x2d5   : > { %v1674_v0 = vpop.permute.xlu1 %1673 }
 0x2da   : > { %v1851_v40 = vpop.permute.xlu1 %1850 }
 0x36c   : > { %v2693_v9 = vpop.f32.mrb[4].mxu0 }
 0x36d   : > { %v2694_v26 = vpop.f32.mrb[5].mxu0 }
 0x36e   : > { %v2695_v51 = vadd.f32 %v2694_v26, %v2693_v9  ;;  %v1891_v26 = vpop.permute.xlu0 %1890 }
 0x370   : > { %v1482_v37 = vadd.f32 %v2695_v51, %v1373_v33 }
 0x372   : > { %v1847_v33 = vpop.permute.xlu0 %1846 }
 0x389   : > { %v2778_v52 = vpop.f32.mrb[2].mxu1 }
 0x38a   : > { %v1556_v53 = vpop.f32.mrb[3].mxu1 }
 0x38b   : > { %v1557_v54 = vadd.f32 %v1556_v53, %v1482_v37  ;;  %v3839_v37 = vpop.permute.xlu0 %1854 }
 0x38d   : > { %v1565_v32 = vmax.f32 %v1557_v54, 0.0 }
 0x38f   : > { %v1931_v54 = vpop.permute.xlu0 %1930 }
 0x390   : > { %v2696_v62 = vpop.f32.mrb[6].mxu0 }
 0x391   : > { %v2697_v55 = vpop.f32.mrb[7].mxu0 }
 0x392   : > { %v2698_v56 = vadd.f32 %v2697_v55, %v2696_v62 }
 0x393   : > { %v3843_v55 = vpop.permute.xlu0 %1938 }
 0x394   : > { %v1487_v60 = vadd.f32 %v2698_v56, %v1378_v59 }
 0x396   : > { %v1562_v27 = vadd.f32 %v2778_v52, %v1487_v60 }
 0x397   : > { %v1967_v59 = vpop.permute.xlu0 %1966 }
 0x398   : > { %v1566_v13 = vmax.f32 %v1562_v27, 0.0 }
 0x39a   : > { %v2917_v6 = vpack.c.bf16 %v1566_v13, %v1565_v32 }
 0x39b   : > { %v3849_v32 = vpop.permute.xlu0 %1974 }
 0x39c   : > { %2918 = vmatpush3.bf16.msra.mxu1 %v2917_v6 }
 0x39f   : > { %2784 = vmatmul.mubr.msk.f32.vlgmr.msra.gmra.mrb[4].mxu1 %vm1574_vm0, %v1567_v19  ;;  %v2051_v6 = vpop.permute.xlu0 %2050 }
 0x3a0   : > { %2788 = vmatprep.mubr.msk.f32.mxu1 %vm1676_vm2, %v1648_v8 }
 0x3a3   : > { %v3853_v8 = vpop.permute.xlu0 %2058 }
 0x472   : > { %v1644_v10 = vpop.f32.mrb[4].mxu1 }
 0x473   : > { %v3785_v12 = vadd.f32 %v1644_v10, %v1572_v5  ;;  %v2785_v14 = vpop.f32.mrb[5].mxu1 }
 0x475   : > { %2786 = vmatprep.subr.mxu1 %v3785_v12 }
 0x476   : > { %2787 = vmatpush3.msra.mxu1 %v3785_v12 }
 0x477   : > { %2789 = vmatmul.mubr.msk.f32.vlgmr.msra.gmra.mrb[6].mxu1 %vm1676_vm2, %v1649_v15  ;;  %2919 = vmatprep.subr.bf16.mxu1 %v3091_v50 }
 0x478   : > { %2791 = vmatprep.mubr.msk.f32.mxu1 %vm1676_vm2, %v1650_v16 }
 0x47b   : > { %2792 = vmatmul.mubr.msk.f32.gmra.mrb[8].mxu1 %vm1676_vm2, %v1651_v18 }
 0x47c   : > { %2802 = vmatprep.mubr.msk.f32.mxu1 %vm3092_vm15, %v3705_v25 }
 0x54a   : > { %v2790_v42 = vpop.f32.mrb[6].mxu1 }
 0x54b   : > { %v1761_v24 = vadd.f32 %v2790_v42, %v1664_v22  ;;  %v1755_v57 = vpop.f32.mrb[7].mxu1 }
 0x54c   : > { %v1756_v58 = vadd.f32 %v1755_v57, %v1659_v61 }
 0x54d   : > { %v1775_v28 = vmax.f32 %v1761_v24, 0.0 }
 0x54e   : > { %v1774_v1 = vmax.f32 %v1756_v58, 0.0  ;;  %v2793_v29 = vpop.f32.mrb[8].mxu1 }
 0x54f   : > { %v1785_v2 = vmul.f32 %v2649_v63, %v1775_v28  ;;  %v1765_v23 = vpop.f32.mrb[9].mxu1  ;;  %v1771_v3 = vadd.f32 %v2793_v29, %v1674_v0 }
 0x550   : > { %v1784_v30 = vmul.f32 %v2649_v63, %v1774_v1  ;;  %v1766_v34 = vadd.f32 %v1765_v23, %v1669_v36 }
 0x551   : > { %1794 = vrot.lane.b32.xlu1 %v1785_v2, %s3093_s26  ;;  %v1777_v31 = vmax.f32 %v1771_v3, 0.0 }
 0x552   : > { %1792 = vrot.lane.b32.xlu0 %v1784_v30, %s3093_s26  ;;  %v1776_v39 = vmax.f32 %v1766_v34, 0.0 }
 0x553   : > { %v1787_v38 = vmul.f32 %v2649_v63, %v1777_v31 }
 0x554   : > { %v1786_v41 = vmul.f32 %v2649_v63, %v1776_v39 }
 0x555   : > { %2098 = vperm.xlu1 %3046, %v3737_v43  }
 0x556   : > { %2094 = vperm.xlu0 %3044, %v3742_v7  }
 0x559   : > { %3047 = vset.pattern.permute.xlu1 %v3079_v17 }
 0x55a   : > { %2134 = vperm.xlu1 %3047, %v3742_v7   ;;  %3048 = vset.pattern.permute.xlu0 %v3079_v17  ;;  %v1887_v17 = vpop.permute.xlu1 %1886 }
 0x55b   : > { %2138 = vperm.xlu0 %3048, %v3737_v43  }
 0x55e   : > { %1798 = vrot.lane.b32.xlu1 %v1787_v38, %s3093_s26 }
 0x55f   : > { %3049 = vset.pattern.permute.xlu1 %v3072_v4  ;;  %3050 = vset.pattern.permute.xlu0 %v3072_v4  ;;  %v3824_v4 = vpop.permute.xlu1 %1858 }
 0x560   : > { %1829 = vperm.xlu0 %3050, %v3742_v7  }
 0x562   : > { %1796 = vrot.lane.b32.xlu1 %v1786_v41, %s3093_s26  ;;  %s3094_s26 = smov 118  }
 0x563   : > { %v1927_v48 = vpop.permute.xlu1 %1926 }
 0x564   : > { %2176 = vperm.xlu0 %3050, %v2166_v44  }
 0x566   : > { %1819 = vperm.xlu1 %3049, %v3728_v20  }
 0x567   : > { %v3833_v46 = vpop.permute.xlu1 %1894 }
 0x568   : > { %2186 = vperm.xlu0 %3050, %v2168_v45  }
 0x56a   : > { %1824 = vperm.xlu1 %3049, %v3721_v21   ;;  %v2087_v21 = vpop.permute.xlu0 %2086 }
 0x56b   : > { %v3835_v35 = vpop.permute.xlu1 %1898 }
 0x56e   : > { %1834 = vperm.xlu1 %3049, %v3737_v43  }
 0x56f   : > { %v1971_v47 = vpop.permute.xlu1 %1970 }
 0x572   : > { %2171 = vperm.xlu1 %3049, %v2165_v11  }
 0x573   : > { %v3837_v9 = vpop.permute.xlu1 %1934 }
 0x576   : > { %2181 = vperm.xlu1 %3049, %v2167_v49  }
 0x577   : > { %v2007_v51 = vpop.permute.xlu1 %2006 }
 0x57b   : > { %v2011_v52 = vpop.permute.xlu1 %2010 }
 0x57f   : > { %v3841_v53 = vpop.permute.xlu1 %1978 }
 0x583   : > { %v2047_v62 = vpop.permute.xlu1 %2046 }
 0x587   : > { %v3845_v56 = vpop.permute.xlu1 %2014 }
 0x58b   : > { %v3847_v60 = vpop.permute.xlu1 %2018 }
 0x58f   : > { %v2091_v27 = vpop.permute.xlu1 %2090 }
 0x593   : > { %v3851_v13 = vpop.permute.xlu1 %2054 }
 0x597   : > { %v2127_v19 = vpop.permute.xlu1 %2126 }
 0x59b   : > { %v2131_v20 = vpop.permute.xlu1 %2130 }
 0x5c3   : > { %v1795_v43 = vpop.permute.xlu1 %1794 }
 0x5c4   : > { %1806 = vst.msk [vmem:[#allocation3 + $0x10] sm:$0xff] %vm1804_vm3, %v1795_v43  ;;  %v1793_v7 = vpop.permute.xlu0 %1792 }
 0x5c5   : > { %1805 = vst.msk [vmem:[#allocation3] sm:$0xff] %vm1804_vm3, %v1793_v7 }
 0x5cb   : > { %v3857_v5 = vld [vmem:[#allocation3 + $0x10] sm:$0xff] }
 0x5cc   : > { %v1862_v10 = vmul.f32 %v1851_v40, %v3857_v5  ;;  %v3860_v14 = vld [vmem:[#allocation3] sm:$0xff]  ;;  %v1902_v16 = vmul.f32 %v1891_v26, %v3857_v5  ;;  %v1942_v42 = vmul.f32 %v1931_v54, %v3857_v5  ;;  %v1982_v24 = vmul.f32 %v1971_v47, %v3857_v5 }
 0x5cd   : > { %v1861_v15 = vmul.f32 %v1847_v33, %v3860_v14  ;;  %v1901_v18 = vmul.f32 %v1887_v17, %v3860_v14  ;;  %v1941_v61 = vmul.f32 %v1927_v48, %v3860_v14  ;;  %v1981_v63 = vmul.f32 %v1967_v59, %v3860_v14 }
 0x5ce   : > { %1871 = vrot.lane.b32.xlu0 %v1862_v10, %s3083_s30  ;;  %v2022_v58 = vmul.f32 %v2011_v52, %v3857_v5  ;;  %v2021_v1 = vmul.f32 %v2007_v51, %v3860_v14  ;;  %v2062_v29 = vmul.f32 %v2051_v6, %v3857_v5  ;;  %v2061_v23 = vmul.f32 %v2047_v62, %v3860_v14 }
 0x5cf   : > { %1869 = vrot.lane.b32.xlu1 %v1861_v15, %s3083_s30  ;;  %v2102_v30 = vmul.f32 %v2091_v27, %v3857_v5  ;;  %v2101_v0 = vmul.f32 %v2087_v21, %v3860_v14  ;;  %v2142_v3 = vmul.f32 %v2131_v20, %v3857_v5  ;;  %v2141_v31 = vmul.f32 %v2127_v19, %v3860_v14 }
 0x5d2   : > { %1911 = vrot.lane.b32.xlu0 %v1902_v16, %s4078_s3 }
 0x5d3   : > { %1909 = vrot.lane.b32.xlu1 %v1901_v18, %s4078_s3 }
 0x5d4   : > { %v2099_v22 = vpop.permute.xlu1 %2098 }
 0x5d6   : > { %1951 = vrot.lane.b32.xlu0 %v1942_v42, %s3094_s26 }
 0x5d7   : > { %1949 = vrot.lane.b32.xlu1 %v1941_v61, %s3094_s26 }
 0x5d9   : > { %v2135_v57 = vpop.permute.xlu1 %2134 }
 0x5da   : > { %1991 = vrot.lane.b32.xlu0 %v1982_v24, %s3095_s28 }
 0x5db   : > { %1989 = vrot.lane.b32.xlu1 %v1981_v63, %s3095_s28 }
 0x5dd   : > { %v1799_v28 = vpop.permute.xlu1 %1798 }
 0x5de   : > { %1808 = vst.msk [vmem:[#allocation3 + $0x30] sm:$0xff] %vm1804_vm3, %v1799_v28  ;;  %2031 = vrot.lane.b32.xlu0 %v2022_v58, %s3096_s4 }
 0x5df   : > { %2029 = vrot.lane.b32.xlu1 %v2021_v1, %s3096_s4 }
 0x5e1   : > { %v1797_v2 = vpop.permute.xlu1 %1796 }
 0x5e2   : > { %1807 = vst.msk [vmem:[#allocation3 + $0x20] sm:$0xff] %vm1804_vm3, %v1797_v2  ;;  %2071 = vrot.lane.b32.xlu0 %v2062_v29, %s4079_s0 }
 0x5e3   : > { %2069 = vrot.lane.b32.xlu1 %v2061_v23, %s4079_s0 }
 0x5e5   : > { %v3892_v36 = vld [vmem:[#allocation3 + $0x30] sm:$0xff]  ;;  %v1820_v52 = vpop.permute.xlu1 %1819 }
 0x5e6   : > { %2111 = vrot.lane.b32.xlu0 %v2102_v30, %s3097_s21  ;;  %v1864_v38 = vmul.f32 %v3824_v4, %v3892_v36  ;;  %v1904_v40 = vmul.f32 %v3835_v35, %v3892_v36  ;;  %v1944_v44 = vmul.f32 %v3843_v55, %v3892_v36  ;;  %v1984_v45 = vmul.f32 %v3841_v53, %v3892_v36 }
 0x5e7   : > { %2109 = vrot.lane.b32.xlu1 %v2101_v0, %s3097_s21  ;;  %v2024_v11 = vmul.f32 %v3847_v60, %v3892_v36  ;;  %v2064_v49 = vmul.f32 %v3853_v8, %v3892_v36  ;;  %v2104_v47 = vmul.f32 %v2099_v22, %v3892_v36  ;;  %v1837_v43 = vmul.f32 %v1820_v52, %v3860_v14 }
 0x5e9   : > { %v3895_v34 = vld [vmem:[#allocation3 + $0x20] sm:$0xff] }
 0x5ea   : > { %2151 = vrot.lane.b32.xlu0 %v2142_v3, %s3098_s24  ;;  %v1863_v39 = vmul.f32 %v3839_v37, %v3895_v34  ;;  %v1903_v41 = vmul.f32 %v3833_v46, %v3895_v34  ;;  %v1943_v17 = vmul.f32 %v3837_v9, %v3895_v34  ;;  %v1983_v4 = vmul.f32 %v3849_v32, %v3895_v34  ;;  %v2095_v46 = vpop.permute.xlu0 %2094  ;;  %v1825_v37 = vpop.permute.xlu1 %1824 }
 0x5eb   : > { %2149 = vrot.lane.b32.xlu1 %v2141_v31, %s3098_s24  ;;  %v2023_v48 = vmul.f32 %v3845_v56, %v3895_v34  ;;  %v2063_v35 = vmul.f32 %v3851_v13, %v3895_v34  ;;  %v2103_v26 = vmul.f32 %v2095_v46, %v3895_v34  ;;  %v2143_v33 = vmul.f32 %v2135_v57, %v3895_v34 }
 0x5ec   : > { %v1838_v21 = vmul.f32 %v1825_v37, %v3857_v5 }
 0x5ee   : > { %1875 = vrot.lane.b32.xlu0 %v1864_v38, %s3083_s30  ;;  %v2139_v9 = vpop.permute.xlu0 %2138  ;;  %v1835_v54 = vpop.permute.xlu1 %1834 }
 0x5ef   : > { %1873 = vrot.lane.b32.xlu1 %v1863_v39, %s3083_s30  ;;  %v2144_v51 = vmul.f32 %v2139_v9, %v3892_v36  ;;  %v1840_v9 = vmul.f32 %v1835_v54, %v3892_v36 }
 0x5f2   : > { %1915 = vrot.lane.b32.xlu0 %v1904_v40, %s4078_s3  ;;  %v1830_v53 = vpop.permute.xlu0 %1829  ;;  %v2172_v55 = vpop.permute.xlu1 %2171 }
 0x5f3   : > { %1913 = vrot.lane.b32.xlu1 %v1903_v41, %s4078_s3  ;;  %s634_s3 = scalar_lea.vmem %s4060_s19, %s2632_s29 }
 0x5f6   : > { %1955 = vrot.lane.b32.xlu0 %v1944_v44, %s3094_s26  ;;  %v2177_v62 = vpop.permute.xlu0 %2176  ;;  %v3945_v59 = vpop.permute.xlu1 %2181 }
 0x5f7   : > { %1953 = vrot.lane.b32.xlu1 %v1943_v17, %s3094_s26 }
 0x5fa   : > { %1995 = vrot.lane.b32.xlu0 %v1984_v45, %s3095_s28  ;;  %v3943_v56 = vpop.permute.xlu0 %2186 }
 0x5fb   : > { %1993 = vrot.lane.b32.xlu1 %v1983_v4, %s3095_s28  ;;  %s4080_s28 = sld [smem:[#allocation8_spill]] }
 0x5fe   : > { %2035 = vrot.lane.b32.xlu0 %v2024_v11, %s3096_s4 }
 0x5ff   : > { %2033 = vrot.lane.b32.xlu1 %v2023_v48, %s3096_s4 }
 0x602   : > { %2075 = vrot.lane.b32.xlu0 %v2064_v49, %s4079_s0  ;;  %v2289_v49 = vld [vmem:[%s4057_s16] sm:$0xff] }
 0x603   : > { %2073 = vrot.lane.b32.xlu1 %v2063_v35, %s4079_s0  ;;  %s638_s0 = scalar_lea.vmem %s4061_s20, %s2632_s29 }
 0x606   : > { %2115 = vrot.lane.b32.xlu0 %v2104_v47, %s3097_s21 }
 0x607   : > { %2113 = vrot.lane.b32.xlu1 %v2103_v26, %s3097_s21 }
 0x60a   : > { %2155 = vrot.lane.b32.xlu0 %v2144_v51, %s3098_s24  ;;  %v1839_v51 = vmul.f32 %v1830_v53, %v3895_v34 }
 0x60b   : > { %2153 = vrot.lane.b32.xlu1 %v2143_v33, %s3098_s24 }
 0x640   : > { %v1872_v60 = vpop.permute.xlu0 %1871 }
 0x641   : > { %v1870_v27 = vpop.permute.xlu1 %1869  ;;  %v1882_v7 = vadd.f32 %v1872_v60, %v1838_v21 }
 0x642   : > { %v1881_v10 = vadd.f32 %v1870_v27, %v1837_v43 }
 0x644   : > { %v1912_v32 = vpop.permute.xlu0 %1911 }
 0x645   : > { %v1910_v13 = vpop.permute.xlu1 %1909  ;;  %v1922_v16 = vadd.f32 %v1912_v32, %v1882_v7 }
 0x646   : > { %v1921_v22 = vadd.f32 %v1910_v13, %v1881_v10 }
 0x648   : > { %v1952_v6 = vpop.permute.xlu0 %1951 }
 0x649   : > { %v1950_v19 = vpop.permute.xlu1 %1949  ;;  %v1962_v42 = vadd.f32 %v1952_v6, %v1922_v16 }
 0x64a   : > { %v1961_v61 = vadd.f32 %v1950_v19, %v1921_v22 }
 0x64c   : > { %v1992_v8 = vpop.permute.xlu0 %1991 }
 0x64d   : > { %v1990_v20 = vpop.permute.xlu1 %1989  ;;  %v2002_v57 = vadd.f32 %v1992_v8, %v1962_v42 }
 0x64e   : > { %v2001_v58 = vadd.f32 %v1990_v20, %v1961_v61 }
 0x650   : > { %v2032_v15 = vpop.permute.xlu0 %2031 }
 0x651   : > { %v2030_v18 = vpop.permute.xlu1 %2029  ;;  %v2042_v28 = vadd.f32 %v2032_v15, %v2002_v57 }
 0x652   : > { %v2041_v1 = vadd.f32 %v2030_v18, %v2001_v58  ;;  %v2296_v58 = vld [vmem:[%s4080_s28] sm:$0xff] }
 0x654   : > { %v2072_v24 = vpop.permute.xlu0 %2071 }
 0x655   : > { %v2070_v63 = vpop.permute.xlu1 %2069  ;;  %v2082_v2 = vadd.f32 %v2072_v24, %v2042_v28  ;;  %v2297_v28 = vld [vmem:[%s4080_s28 + $0x8] sm:$0xff] }
 0x656   : > { %v2081_v23 = vadd.f32 %v2070_v63, %v2041_v1  ;;  %v2389_v63 = vld [vmem:[%s4059_s18] sm:$0xff]  ;;  %v2299_v1 = vld [vmem:[%s4080_s28 + $0x18] sm:$0xff] }
 0x658   : > { %v2112_v29 = vpop.permute.xlu0 %2111 }
 0x659   : > { %v2110_v5 = vpop.permute.xlu1 %2109  ;;  %v2122_v30 = vadd.f32 %v2112_v29, %v2082_v2  ;;  %v2300_v2 = vld [vmem:[%s4080_s28 + $0x20] sm:$0xff] }
 0x65a   : > { %v2121_v14 = vadd.f32 %v2110_v5, %v2081_v23  ;;  %v2301_v5 = vld [vmem:[%s4080_s28 + $0x28] sm:$0xff] }
 0x65b   : > { %v2932_v23 = vpack.c.bf16 %v2301_v5, %v2300_v2 }
 0x65c   : > { %v2152_v0 = vpop.permute.xlu0 %2151 }
 0x65d   : > { %v2162_v3 = vadd.f32 %v2152_v0, %v2122_v30  ;;  %v2150_v31 = vpop.permute.xlu1 %2149  ;;  %v2302_v30 = vld [vmem:[%s4080_s28 + $0x30] sm:$0xff] }
 0x65e   : > { %v2161_v38 = vadd.f32 %v2150_v31, %v2121_v14  ;;  %v2303_v14 = vld [vmem:[%s4080_s28 + $0x38] sm:$0xff]  ;;  %v2305_v31 = vld [vmem:[%s4080_s28 + $0x48] sm:$0xff] }
 0x65f   : > { %v2190_v39 = vadd.f32 %v2177_v62, %v2162_v3  ;;  %v2935_v0 = vpack.c.bf16 %v2303_v14, %v2302_v30  ;;  %v2304_v3 = vld [vmem:[%s4080_s28 + $0x40] sm:$0xff] }
 0x660   : > { %v2189_v40 = vadd.f32 %v2172_v55, %v2161_v38  ;;  %v1876_v41 = vpop.permute.xlu0 %1875  ;;  %v2938_v38 = vpack.c.bf16 %v2305_v31, %v2304_v3 }
 0x661   : > { %v2194_v44 = vmax.f32 %v2190_v39, 0.0  ;;  %v1874_v17 = vpop.permute.xlu1 %1873  ;;  %v1884_v33 = vadd.f32 %v1876_v41, %v1840_v9  ;;  %v2306_v39 = vld [vmem:[%s4080_s28 + $0x50] sm:$0xff] }
 0x662   : > { %v2193_v45 = vmax.f32 %v2189_v40, 0.0  ;;  %v1883_v52 = vadd.f32 %v1874_v17, %v1839_v51  ;;  %v2307_v40 = vld [vmem:[%s4080_s28 + $0x58] sm:$0xff] }
 0x663   : > { %v2941_v41 = vpack.c.bf16 %v2307_v40, %v2306_v39 }
 0x664   : > { %v3051_v4 = vpack.i.bf16 %v2194_v44, %v2193_v45  ;;  %v1916_v11 = vpop.permute.xlu0 %1915 }
 0x665   : > { %v1914_v48 = vpop.permute.xlu1 %1913  ;;  %v1924_v62 = vadd.f32 %v1916_v11, %v1884_v33 }
 0x666   : > { %3052 = vrot.lane.b32.xlu1 %v3051_v4, %s3090_s25  ;;  %v1923_v60 = vadd.f32 %v1914_v48, %v1883_v52  ;;  %v2388_v52 = vld [vmem:[%s4058_s17] sm:$0xff] }
 0x668   : > { %v1956_v46 = vpop.permute.xlu0 %1955 }
 0x669   : > { %v1954_v35 = vpop.permute.xlu1 %1953  ;;  %v1964_v27 = vadd.f32 %v1956_v46, %v1924_v62 }
 0x66a   : > { %2292 = vperm.xlu1 %3049, %v2289_v49   ;;  %v1963_v32 = vadd.f32 %v1954_v35, %v1923_v60  ;;  %v2197_v35 = vld [vmem:[%s4056_s15] sm:$0xff] }
 0x66c   : > { %v1996_v47 = vpop.permute.xlu0 %1995 }
 0x66d   : > { %v1994_v26 = vpop.permute.xlu1 %1993  ;;  %v2004_v6 = vadd.f32 %v1996_v47, %v1964_v27  ;;  %v2308_v47 = vld [vmem:[%s4080_s28 + $0x60] sm:$0xf] }
 0x66e   : > { %v2003_v8 = vadd.f32 %v1994_v26, %v1963_v32 }
 0x670   : > { %v2036_v37 = vpop.permute.xlu0 %2035 }
 0x671   : > { %v2034_v55 = vpop.permute.xlu1 %2033  ;;  %v2044_v21 = vadd.f32 %v2036_v37, %v2004_v6 }
 0x672   : > { %v2043_v20 = vadd.f32 %v2034_v55, %v2003_v8 }
 0x674   : > { %v2076_v13 = vpop.permute.xlu0 %2075 }
 0x675   : > { %v2074_v19 = vpop.permute.xlu1 %2073  ;;  %v2084_v7 = vadd.f32 %v2076_v13, %v2044_v21 }
 0x676   : > { %v2083_v54 = vadd.f32 %v2074_v19, %v2043_v20 }
 0x678   : > { %v2116_v43 = vpop.permute.xlu0 %2115 }
 0x679   : > { %v2114_v36 = vpop.permute.xlu1 %2113  ;;  %v2124_v10 = vadd.f32 %v2116_v43, %v2084_v7 }
 0x67a   : > { %v2123_v34 = vadd.f32 %v2114_v36, %v2083_v54 }
 0x67c   : > { %v2156_v53 = vpop.permute.xlu0 %2155 }
 0x67d   : > { %v2164_v15 = vadd.f32 %v2156_v53, %v2124_v10  ;;  %v2154_v16 = vpop.permute.xlu1 %2153 }
 0x67e   : > { %v2163_v18 = vadd.f32 %v2154_v16, %v2123_v34 }
 0x67f   : > { %v2192_v22 = vadd.f32 %v3943_v56, %v2164_v15  ;;  %v2298_v56 = vld [vmem:[%s4080_s28 + $0x10] sm:$0xff] }
 0x680   : > { %v2191_v42 = vadd.f32 %v3945_v59, %v2163_v18  ;;  %v2926_v59 = vpack.c.bf16 %v2297_v28, %v2296_v58  ;;  %v2929_v29 = vpack.c.bf16 %v2299_v1, %v2298_v56 }
 0x681   : > { %v2196_v61 = vmax.f32 %v2192_v22, 0.0 }
 0x682   : > { %v2195_v24 = vmax.f32 %v2191_v42, 0.0  ;;  %2927 = vmatpush3.bf16.msra.mxu0 %v2926_v59 }
 0x683   : > { %2928 = vmatprep.subr.bf16.mxu0 %v3091_v50 }
 0x684   : > { %v3056_v57 = vpack.i.bf16 %v2196_v61, %v2195_v24 }
 0x686   : > { %3057 = vrot.lane.b32.xlu0 %v3056_v57, %s3090_s25  ;;  %2930 = vmatpush3.bf16.msra.mxu0 %v2929_v29 }
 0x687   : > { %2931 = vmatprep.subr.bf16.mxu0 %v3091_v50 }
 0x68a   : > { %2392 = vperm.xlu0 %3050, %v2389_v63   ;;  %2933 = vmatpush3.bf16.msra.mxu0 %v2932_v23 }
 0x68b   : > { %2934 = vmatprep.subr.bf16.mxu0 %v3091_v50 }
 0x68e   : > { %2936 = vmatpush3.bf16.msra.mxu0 %v2935_v0 }
 0x68f   : > { %2937 = vmatprep.subr.bf16.mxu0 %v3091_v50 }
 0x692   : > { %2939 = vmatpush3.bf16.msra.mxu0 %v2938_v38 }
 0x693   : > { %2940 = vmatprep.subr.bf16.mxu0 %v3091_v50 }
 0x696   : > { %2942 = vmatpush3.bf16.msra.mxu0 %v2941_v41 }
 0x697   : > { %2829 = vmatprep.subr.mxu0 %v3705_v25 }
 0x69a   : > { %2830 = vmatpush3.msk.msra.mxu0 %vm682_vm1, %v2308_v47 }
 0x69b   : > { %2834 = vmatprep.subr.mxu0 %v3705_v25 }
 0x6d8   : > { %v3053_v44 = vpop.permute.xlu1 %3052 }
 0x6d9   : > { %v3055_v17 = vunpack.i.h.bf16 %v3053_v44  ;;  %v3054_v45 = vunpack.i.l.bf16 %v3053_v44 }
 0x6db   : > { %v2920_v4 = vpack.c.bf16 %v3055_v17, %v3054_v45 }
 0x6dd   : > { %2921 = vmatpush3.bf16.msra.mxu1 %v2920_v4 }
 0x6de   : > { %2922 = vmatprep.subr.bf16.mxu1 %v3091_v50 }
 0x6e9   : > { %v2293_v33 = vpop.permute.xlu1 %2292 }
 0x6f8   : > { %v3058_v11 = vpop.permute.xlu0 %3057 }
 0x6f9   : > { %v3060_v48 = vunpack.i.h.bf16 %v3058_v11  ;;  %v3059_v49 = vunpack.i.l.bf16 %v3058_v11 }
 0x6fb   : > { %v2923_v46 = vpack.c.bf16 %v3060_v48, %v3059_v49 }
 0x6fd   : > { %2924 = vmatpush3.bf16.msra.mxu1 %v2923_v46 }
 0x6fe   : > { %2943 = vmatprep.subr.bf16.mxu1 %v3091_v50 }
 0x700   : > { %2803 = vmatmul.mubr.msk.f32.vlgmr.msra.gmra.mrb[10].mxu1 %vm2214_vm4, %v2197_v35 }
 0x701   : > { %2945 = vmatpush3.bf16.msra.mxu1 %v2926_v59  ;;  %2865 = vmatprep.mubr.msk.f32.mxu1 %vm3092_vm15, %v3705_v25 }
 0x702   : > { %2946 = vmatprep.subr.bf16.mxu1 %v3091_v50 }
 0x705   : > { %2948 = vmatpush3.bf16.msra.mxu1 %v2929_v29 }
 0x706   : > { %2949 = vmatprep.subr.bf16.mxu1 %v3091_v50 }
 0x709   : > { %2951 = vmatpush3.bf16.msra.mxu1 %v2932_v23  ;;  %v2393_v62 = vpop.permute.xlu0 %2392 }
 0x70a   : > { %2952 = vmatprep.subr.bf16.mxu1 %v3091_v50 }
 0x70d   : > { %2954 = vmatpush3.bf16.msra.mxu1 %v2935_v0 }
 0x70e   : > { %2955 = vmatprep.subr.bf16.mxu1 %v3091_v50 }
 0x711   : > { %2957 = vmatpush3.bf16.msra.mxu1 %v2938_v38 }
 0x712   : > { %2958 = vmatprep.subr.bf16.mxu1 %v3091_v50 }
 0x715   : > { %2960 = vmatpush3.bf16.msra.mxu1 %v2941_v41 }
 0x716   : > { %2863 = vmatprep.subr.mxu1 %v3705_v25 }
 0x719   : > { %2864 = vmatpush3.msk.msra.mxu1 %vm682_vm1, %v2308_v47  ;;  %vm2386_vm1 = vcmask 523264  }
 0x7d3   : > { %v2284_v9 = vpop.f32.mrb[10].mxu1 }
 0x7d4   : > { %v2288_v26 = vadd.f32 %v2284_v9, %v3785_v12  ;;  %v2804_v51 = vpop.f32.mrb[11].mxu1 }
 0x7d6   : > { %v2295_v50 = vadd.f32 %v2293_v33, %v2288_v26 }
 0x7d8   : > { %2832 = vmatmul.mubr.msk.f32.vlgmr.msra.gmra.mrb[8].mxu0 %vm2309_vm5, %v2295_v50 }
 0x7d9   : > { %2835 = vmatpush3.msra.mxu0 %v2295_v50  ;;  %2836 = vmatprep.mubr.msk.f32.mxu0 %vm3092_vm15, %v3705_v25 }
 0x7dc   : > { %2837 = vmatmul.mubr.msk.f32.vlgmr.msra.gmra.mrb[10].mxu0 %vm1676_vm2, %v2388_v52 }
 0x8ab   : > { %v2382_v12 = vpop.f32.mrb[8].mxu0 }
 0x8ac   : > { %2387 = vst.msk [vmem:[%s634_s3] sm:$0xff] %vm2386_vm1, %v2382_v12  ;;  %v2833_v37 = vpop.f32.mrb[9].mxu0 }
 0x8af   : > { %v2464_v55 = vpop.f32.mrb[10].mxu0 }
 0x8b0   : > { %v2465_v60 = vadd.f32 %v2464_v55, %v2393_v62  ;;  %v2838_v27 = vpop.f32.mrb[11].mxu0 }
 0x8b2   : > { %2866 = vmatmul.mubr.msk.f32.vlgmr.msra.gmra.mrb[12].mxu1 %vm2309_vm5, %v2465_v60 }
 0x985   : > { %v2537_v25 = vpop.f32.mrb[12].mxu1 }
 0x986   : > { %2541 = vst.msk [vmem:[%s638_s0] sm:$0xff] %vm2386_vm1, %v2537_v25  ;;  %v2867_v32 = vpop.f32.mrb[13].mxu1 }
 0x987 PF: > { %s31_s1 = sadd.s32 1, %s3069_s1  }
 0x988   : > { %p28_p4 = scmp.ge.s32.totalorder %s31_s1, 4  }
 0x98a   :  { %30 = sbr.rel (!%p28_p4) target bundleno = 6 (0x6), region = 138 }

</bundles_post_ra>
